<compile_context>
chip_gen: v7x
topology: tpu7x:2x2x1
jax: 0.10.0
libtpu: 0.0.40
codegen_flags: <defaults>
</compile_context>

<pallas_src>
import functools
import numpy as np

import jax
import jax.numpy as jnp
from jax import lax
from jax.experimental import pallas as pl
from jax.experimental.pallas import tpu as pltpu


def _round_up(x, m):
    return ((x + m - 1) // m) * m


# ---------------------------------------------------------------------------
# Pallas kernel: grouped attention core (per batch, head, query tile)
#
#   cs[m, s, (g, n)] = sum_c q[c, g, n] * k[c, m, s]        (scale pre-folded)
#   p                = softmax over s (key-spatial positions only, per key
#                      group m -- exactly the torch `.view(*shape[:-2], -1)`
#                      softmax; the group-embedding score is constant along s
#                      and cancels, so it is never computed)
#   out[c, n]        = sum_{g, m, s} p[m, s, (g, n)] * v[c, m, s]
# ---------------------------------------------------------------------------
def _group_attn_kernel(q_ref, kv_ref, o_ref, *, m_groups, s_valid, use_bf16_exp):
    # q_ref:  (1, 1, c, G, Nt)     bf16  queries (scale folded in), g-major
    # kv_ref: (1, 1, 2c, M*S_pad)  bf16  rows [0, c) = keys, rows [c, 2c) = values
    # o_ref:  (1, 1, c, Nt)        f32   per-head attention output
    c, G, Nt = q_ref.shape[2], q_ref.shape[3], q_ref.shape[4]
    msp = kv_ref.shape[3]
    M = m_groups
    s_pad = msp // M
    GN = G * Nt

    q = q_ref[0, 0].reshape(c, GN)               # (c, G*Nt): g-major lane layout
    kv = kv_ref[0, 0]
    k = kv[:c, :]                                # (c, M*S_pad)
    v = kv[c:, :]                                # (c, M*S_pad)

    # Content scores: one fused MXU matmul over all key groups / positions.
    cs = lax.dot_general(k, q, (((0,), (0,)), ((), ())),
                         preferred_element_type=jnp.float32)   # (M*S_pad, G*Nt)
    cs = cs.reshape(M, s_pad, GN)

    # Mask padded key-spatial rows once, before any broadcasting / exp.
    if s_pad > s_valid:
        s_idx = lax.broadcasted_iota(jnp.int32, (1, s_pad, 1), 1)
        cs = cs + jnp.where(s_idx < s_valid, 0.0, -1e30).astype(jnp.float32)

    # Softmax over the key-spatial axis only (per key group m).
    cs = cs - jnp.max(cs, axis=1, keepdims=True)
    if use_bf16_exp:                             # v6e / v7x: bf16 EUP exp
        p = jnp.exp(cs.astype(jnp.bfloat16))
        denom = jnp.sum(p.astype(jnp.float32), axis=1, keepdims=True)
        pb = p * pl.reciprocal(denom, approx=True).astype(jnp.bfloat16)
    else:                                        # v5e: no bf16 VPU / EUP
        p = jnp.exp(cs)
        denom = jnp.sum(p, axis=1, keepdims=True)
        pb = (p * pl.reciprocal(denom, approx=True)).astype(jnp.bfloat16)

    # Attention @ value: one MXU matmul, full (m, s) contraction fused.
    r = jnp.dot(v, pb.reshape(M * s_pad, GN),
                preferred_element_type=jnp.float32)            # (c, G*Nt)

    # Contract the query-group axis g (aligned lane segments of width Nt).
    acc = r[:, :Nt]
    for g in range(1, G):
        acc = acc + r[:, g * Nt:(g + 1) * Nt]
    # f32 output (already V-deduplicated); bf16 output would be a further
    # writeback saving on v5e if needed.
    o_ref[0, 0] = acc


def _use_bf16_exp_default():
    # bf16 exp on the EUP is a v6e/v7x feature; keep softmax math f32 elsewhere.
    try:
        kind = jax.devices()[0].device_kind.lower()
    except Exception:
        return False
    return any(tag in kind for tag in ("v6", "v7", "tpu7"))


def _pick_q_block(n, g, m, s_pad, budget_bytes=20 * 1024 * 1024):
    """Largest 128-aligned query tile whose score temporaries fit the VMEM
    budget and whose query-padding overhead stays small."""
    n128 = _round_up(n, 128)
    for cand in (1024, 512, 256, 128):
        if cand > n128:
            continue
        if cand > 128 and _round_up(n, cand) - n > max(n // 4, 128):
            continue                           # too much query padding
        if cand > 128 and m * s_pad * g * cand * 10 > budget_bytes:
            continue                           # ~10 B / score element (f32+bf16)
        return cand
    return 128


def group_attention_pallas(q, kv, *, m_groups, s_valid, q_block,
                           use_bf16_exp=None):
    """q:  (B, H, c, G, N_pad)  bf16, softmax scale folded in
       kv: (B, H, 2c, M*S_pad)  bf16, keys stacked on top of values
       returns (B, H, c, N_pad) f32 attention output (summed over g and m)."""
    B, H, c, G, n_pad = q.shape
    msp = kv.shape[3]
    if use_bf16_exp is None:
        use_bf16_exp = _use_bf16_exp_default()
    assert n_pad % q_block == 0
    grid = (B, H, n_pad // q_block)

    kernel = functools.partial(_group_attn_kernel, m_groups=m_groups,
                               s_valid=s_valid, use_bf16_exp=use_bf16_exp)
    return pl.pallas_call(
        kernel,
        out_shape=jax.ShapeDtypeStruct((B, H, c, n_pad), jnp.float32),
        grid_spec=pltpu.PrefetchScalarGridSpec(
            num_scalar_prefetch=0,
            grid=grid,
            in_specs=[
                pl.BlockSpec((1, 1, c, G, q_block),
                             lambda b, h, t: (b, h, 0, 0, t)),
                pl.BlockSpec((1, 1, 2 * c, msp),
                             lambda b, h, t: (b, h, 0, 0)),
            ],
            out_specs=pl.BlockSpec((1, 1, c, q_block),
                                   lambda b, h, t: (b, h, 0, t)),
        ),
        compiler_params=pltpu.CompilerParams(
            dimension_semantics=("parallel", "parallel", "parallel"),
            # Sized for the footprint (score temps <= ~20 MiB by construction):
            # under v7x's 64 MiB physical VMEM, above v5e's 16 MiB default.
            vmem_limit_bytes=32 * 1024 * 1024),
    )(q, kv)


# ---------------------------------------------------------------------------
# Plain-JAX glue: conv projections (depthwise Conv3d + BN), 1x1 convs, params
# ---------------------------------------------------------------------------
def depthwise_conv3d(x, w, stride, padding):
    # x: (B, C, D, H, W); w: (C, 1, kD, kH, kW)  (PyTorch groups=C layout)
    return lax.conv_general_dilated(
        x, w, window_strides=stride,
        padding=[(p, p) for p in padding],
        dimension_numbers=("NCDHW", "OIDHW", "NCDHW"),
        feature_group_count=x.shape[1])


def batchnorm3d(x, p, eps=1e-5):
    # inference-mode BatchNorm3d with deterministic (gamma, beta, mean, var)
    gamma, beta, mean, var = p
    s = (1, -1, 1, 1, 1)
    return (x - mean.reshape(s)) * lax.rsqrt(var.reshape(s) + eps) \
        * gamma.reshape(s) + beta.reshape(s)


def conv1x1_3d(x, w, b):
    # 1x1x1 Conv3d: w: (C_out, C_in), b: (C_out,)
    return jnp.einsum("bcdhw,oc->bodhw", x, w) + b.reshape(1, -1, 1, 1, 1)


def cyclic_group_indices(n):
    # TODO(synk): the real module builds g_indices via group.left_action_on_G /
    # group.relative_positions (external group object); here we use the
    # deterministic cyclic-group table g_indices[v, g, m] = (m - g + v) mod n.
    v = np.arange(n).reshape(n, 1, 1)
    g = np.arange(n).reshape(1, n, 1)
    m = np.arange(n).reshape(1, 1, n)
    return jnp.asarray((m - g + v) % n, dtype=jnp.int32)


def init_params(key, dim_in, dim_out, num_heads, n_group, kernel_size=3):
    c_head = dim_out // num_heads
    ks = list(jax.random.split(key, 16))
    nrm = lambda k, shape, s=0.1: s * jax.random.normal(k, shape, jnp.float32)

    def bn_params(k):
        k1, k2, k3, k4 = jax.random.split(k, 4)
        return (1.0 + nrm(k1, (dim_in,)),                                 # gamma
                nrm(k2, (dim_in,)),                                       # beta
                nrm(k3, (dim_in,)),                                       # mean
                1.0 + 0.1 * jax.random.uniform(k4, (dim_in,), jnp.float32))  # var

    return {
        "dwq_w": nrm(ks[0], (dim_in, 1, kernel_size, kernel_size, kernel_size)),
        "dwk_w": nrm(ks[1], (dim_in, 1, kernel_size, kernel_size, kernel_size)),
        "dwv_w": nrm(ks[2], (dim_in, 1, kernel_size, kernel_size, kernel_size)),
        "bnq": bn_params(ks[3]),
        "bnk": bn_params(ks[4]),
        "bnv": bn_params(ks[5]),
        "pq_w": nrm(ks[6], (dim_out, dim_in)), "pq_b": nrm(ks[7], (dim_out,), 0.01),
        "pk_w": nrm(ks[8], (dim_out, dim_in)), "pk_b": nrm(ks[9], (dim_out,), 0.01),
        "pv_w": nrm(ks[10], (dim_out, dim_in)), "pv_b": nrm(ks[11], (dim_out,), 0.01),
        "po_w": nrm(ks[12], (dim_out // num_heads, dim_out)),
        "po_b": nrm(ks[13], (dim_out // num_heads,), 0.01),
        # Kept only for the torch-style reference: the group-embedding score is
        # constant along the module's softmax axis and cancels, so it has no
        # effect on the forward output.
        "group_emb": jax.random.normal(ks[14], (n_group, c_head), jnp.float32),
        "g_indices": cyclic_group_indices(n_group),
    }


def forward_conv(params, x):
    # method='dw_bn': depthwise Conv3d + BatchNorm3d; stride_q=1, stride_kv=(1,2,2)
    q = batchnorm3d(depthwise_conv3d(x, params["dwq_w"], (1, 1, 1), (1, 1, 1)), params["bnq"])
    k = batchnorm3d(depthwise_conv3d(x, params["dwk_w"], (1, 2, 2), (1, 3, 3)), params["bnk"])
    v = batchnorm3d(depthwise_conv3d(x, params["dwv_w"], (1, 2, 2), (1, 3, 3)), params["bnv"])
    return q, k, v


def attention_pallas(params, q_bn, k_bn, v_bn, *, num_heads, dim_out):
    """Fused 1x1 projections (emitted directly in kernel layout) + Pallas core.

    q_bn: (B, dim_in, G, I, J); k_bn / v_bn: (B, dim_in, M, K, L)
    returns the per-head attention output (B, H, c, I*J) -- identical for every
    output-group element v, which the caller broadcasts."""
    scale = dim_out ** (-0.5)
    c = dim_out // num_heads
    B, dim_in, G, I, J = q_bn.shape
    M, K, L = k_bn.shape[2], k_bn.shape[3], k_bn.shape[4]
    N, S = I * J, K * L
    S_pad = _round_up(S, 8)
    q_block = _pick_q_block(N, G, M, S_pad)
    N_pad = _round_up(N, q_block)

    # Score scale folded into the q projection (free); operands handed to the
    # kernel in bf16 and already in its native layouts (no transpose pass).
    wq = params["pq_w"].reshape(num_heads, c, dim_in) * scale
    bq = params["pq_b"].reshape(num_heads, c) * scale
    wk = params["pk_w"].reshape(num_heads, c, dim_in)
    bk = params["pk_b"].reshape(num_heads, c)
    wv = params["pv_w"].reshape(num_heads, c, dim_in)
    bv = params["pv_b"].reshape(num_heads, c)

    qk = jnp.einsum("bdgxy,hcd->bhcgxy", q_bn, wq) + bq[None, :, :, None, None, None]
    qk = qk.reshape(B, num_heads, c, G, N)
    qk = jnp.pad(qk, ((0, 0),) * 4 + ((0, N_pad - N),)).astype(jnp.bfloat16)

    kk = jnp.einsum("bdmxy,hcd->bhcmxy", k_bn, wk) + bk[None, :, :, None, None, None]
    vk = jnp.einsum("bdmxy,hcd->bhcmxy", v_bn, wv) + bv[None, :, :, None, None, None]
    kv = jnp.concatenate([kk.reshape(B, num_heads, c, M, S),
                          vk.reshape(B, num_heads, c, M, S)], axis=2)
    kv = jnp.pad(kv, ((0, 0),) * 4 + ((0, S_pad - S),))
    kv = kv.reshape(B, num_heads, 2 * c, M * S_pad).astype(jnp.bfloat16)

    out = group_attention_pallas(qk, kv, m_groups=M, s_valid=S, q_block=q_block)
    return out[..., :N]                                       # (B, H, c, N) f32


# ---------------------------------------------------------------------------
# Full forward (method='dw_bn', with_cls_token=False, dropout p=0 -> identity)
# ---------------------------------------------------------------------------
def conv_attention3d_forward(params, x, *, dim_out, num_heads):
    q_bn, k_bn, v_bn = forward_conv(params, x)
    B, _, G, I, J = q_bn.shape
    c = dim_out // num_heads
    c_out, V = params["po_w"].shape[0], params["g_indices"].shape[0]

    att = attention_pallas(params, q_bn, k_bn, v_bn,
                           num_heads=num_heads, dim_out=dim_out)   # (B, H, c, N)

    # proj_out (1x1 Conv3d) consumes the kernel's native layout directly: torch
    # rearranges 'b c h v i j -> b (c h) v i j', so po_w columns are (c, h)
    # c-major.  No post-kernel HBM transpose.
    po_w = params["po_w"].reshape(c_out, c, num_heads)
    out = jnp.einsum("bhcn,och->bon", att, po_w) + params["po_b"][None, :, None]
    out = out.reshape(B, c_out, I, J)

    # The module's softmax is over the key-spatial axis only, so the
    # group-embedding score cancels and every output-group slice is identical:
    # compute once, broadcast across V.
    return jnp.broadcast_to(out[:, :, None, :, :], (B, c_out, V, I, J))


# ---------------------------------------------------------------------------
# Pure-JAX torch-style reference (including the group embeddings) for checking
# ---------------------------------------------------------------------------
def project_heads_reference(params, q_bn, k_bn, v_bn, *, num_heads, dim_out):
    c = dim_out // num_heads

    def proj_split(t, w, b):
        t = conv1x1_3d(t, w, b)                      # (B, dim_out, D, X, Y)
        B, _, D, X, Y = t.shape
        t = t.reshape(B, num_heads, c, D, X, Y)
        return jnp.transpose(t, (0, 2, 1, 3, 4, 5))  # (B, c, H, D, X, Y)

    q6 = proj_split(q_bn, params["pq_w"], params["pq_b"])
    k6 = proj_split(k_bn, params["pk_w"], params["pk_b"])
    v6 = proj_split(v_bn, params["pv_w"], params["pv_b"])
    return q6, k6, v6


def attention_core_reference(q6, k6, v6, g_emb, scale):
    # Mirrors the torch einsums / softmax axis exactly (f32, HIGHEST).
    hp = lax.Precision.HIGHEST
    g_scores = jnp.einsum("bchgij,vgmc->bhvgijm", q6, g_emb, precision=hp)
    attn_c = jnp.einsum("bchgij,bchmkl->bhgijmkl", q6, k6, precision=hp)[:, :, None]
    score = (g_scores[..., None, None] + attn_c) * scale
    shp = score.shape
    attn = jax.nn.softmax(score.reshape(shp[:-2] + (-1,)), axis=-1).reshape(shp)
    return jnp.einsum("bhvgijmkl,bchmkl->bchvij", attn, v6, precision=hp)


def conv_attention3d_reference(params, x, *, dim_out, num_heads):
    q_bn, k_bn, v_bn = forward_conv(params, x)
    q6, k6, v6 = project_heads_reference(params, q_bn, k_bn, v_bn,
                                         num_heads=num_heads, dim_out=dim_out)
    g_emb = params["group_emb"][params["g_indices"]]           # (V, G, M, c)
    out6 = attention_core_reference(q6, k6, v6, g_emb, dim_out ** (-0.5))
    B, c, H, V, I, J = out6.shape
    out = out6.reshape(B, c * H, V, I, J)                      # 'b (c h) v i j'
    return conv1x1_3d(out, params["po_w"], params["po_b"])


if __name__ == "__main__":
    B, dim_in, dim_out, num_heads = 2, 8, 8, 2
    n_group, H, W = 4, 8, 8

    root = jax.random.PRNGKey(0)
    kx, kp = jax.random.split(root)
    x = jax.random.normal(kx, (B, dim_in, n_group, H, W), jnp.float32)
    params = init_params(kp, dim_in, dim_out, num_heads, n_group)

    fwd = jax.jit(functools.partial(conv_attention3d_forward,
                                    dim_out=dim_out, num_heads=num_heads))
    out = jax.block_until_ready(fwd(params, x))
    assert out.shape == (B, dim_out // num_heads, n_group, H, W), out.shape

    # Correctness: Pallas forward vs pure-JAX torch-style reference forward
    # (the reference includes the group-embedding scores, which cancel).
    want = jax.block_until_ready(
        conv_attention3d_reference(params, x, dim_out=dim_out,
                                   num_heads=num_heads))
    np.testing.assert_allclose(np.asarray(out), np.asarray(want),
                               rtol=1e-2, atol=1e-2)

    print("KERNEL_OK")
</pallas_src>

<mosaic_0001>
module attributes {stable_mosaic.version = 11 : i64} {
  func.func @_group_attn_kernel(%arg0: i32, %arg1: i32, %arg2: i32, %arg3: memref<1x1x4x4x128xbf16, #tpu.memory_space<vmem>>, %arg4: memref<1x1x8x160xbf16, #tpu.memory_space<vmem>>, %arg5: memref<1x1x4x128xf32, #tpu.memory_space<vmem>>) attributes {dimension_semantics = [#tpu.dimension_semantics<parallel>, #tpu.dimension_semantics<parallel>, #tpu.dimension_semantics<parallel>], iteration_bounds = array<i64: 2, 2, 1>, scalar_prefetch = 0 : i64, scratch_operands = 0 : i64, tpu.core_type = #tpu.core_type<tc>, window_params = [{transform_indices = @transform_0, window_bounds = array<i64: 1, 1, 4, 4, 128>}, {transform_indices = @transform_1, window_bounds = array<i64: 1, 1, 8, 160>}, {transform_indices = @transform_2, window_bounds = array<i64: 1, 1, 4, 128>}]} {
    %c0 = arith.constant 0 : index
    %c0_0 = arith.constant 0 : index
    %c0_1 = arith.constant 0 : index
    %c0_2 = arith.constant 0 : index
    %c0_3 = arith.constant 0 : index
    %0 = vector.load %arg3[%c0, %c0_0, %c0_1, %c0_2, %c0_3] : memref<1x1x4x4x128xbf16, #tpu.memory_space<vmem>>, vector<1x1x4x4x128xbf16>
    %1 = vector.shape_cast %0 : vector<1x1x4x4x128xbf16> to vector<4x4x128xbf16>
    %2 = vector.shape_cast %1 : vector<4x4x128xbf16> to vector<4x512xbf16>
    %c0_4 = arith.constant 0 : index
    %c0_5 = arith.constant 0 : index
    %c0_6 = arith.constant 0 : index
    %c0_7 = arith.constant 0 : index
    %3 = vector.load %arg4[%c0_4, %c0_5, %c0_6, %c0_7] : memref<1x1x8x160xbf16, #tpu.memory_space<vmem>>, vector<1x1x8x160xbf16>
    %4 = vector.shape_cast %3 : vector<1x1x8x160xbf16> to vector<8x160xbf16>
    %5 = vector.extract_strided_slice %4 {offsets = [0, 0], sizes = [4, 160], strides = [1, 1]} : vector<8x160xbf16> to vector<4x160xbf16>
    %6 = vector.extract_strided_slice %4 {offsets = [4, 0], sizes = [4, 160], strides = [1, 1]} : vector<8x160xbf16> to vector<4x160xbf16>
    %cst = arith.constant dense<0.000000e+00> : vector<160x512xf32>
    %7 = tpu.matmul %5, %2, %cst {dimension_numbers = #tpu.dot_dimension_numbers<[0], [0], [1], [1], [0, 1, 1, 1], [], []>} : vector<4x160xbf16>, vector<4x512xbf16>, vector<160x512xf32> -> vector<160x512xf32>
    %8 = vector.shape_cast %7 : vector<160x512xf32> to vector<4x40x512xf32>
    %9 = tpu.iota {dimensions = array<i32: 1>} : vector<1x40x1xi32>
    %c36_i32 = arith.constant 36 : i32
    %10 = vector.broadcast %c36_i32 : i32 to vector<1x40x1xi32>
    %11 = arith.cmpi slt, %9, %10 : vector<1x40x1xi32>
    %cst_8 = arith.constant 0.000000e+00 : f32
    %cst_9 = arith.constant -1.000000e+30 : f32
    %12 = vector.broadcast %cst_8 : f32 to vector<1x40x1xf32>
    %13 = vector.broadcast %cst_9 : f32 to vector<1x40x1xf32>
    %14 = arith.select %11, %12, %13 : vector<1x40x1xi1>, vector<1x40x1xf32>
    %15 = vector.broadcast %14 : vector<1x40x1xf32> to vector<4x40x512xf32>
    %16 = arith.addf %8, %15 : vector<4x40x512xf32>
    %cst_10 = arith.constant dense<0xFF800000> : vector<4x512xf32>
    %17 = vector.multi_reduction <maximumf>, %16, %cst_10 [1] : vector<4x40x512xf32> to vector<4x512xf32>
    %18 = vector.shape_cast %17 : vector<4x512xf32> to vector<4x1x512xf32>
    %19 = vector.broadcast %18 : vector<4x1x512xf32> to vector<4x40x512xf32>
    %20 = arith.subf %16, %19 : vector<4x40x512xf32>
    %21 = math.exp %20 : vector<4x40x512xf32>
    %cst_11 = arith.constant dense<0.000000e+00> : vector<4x512xf32>
    %22 = vector.multi_reduction <add>, %21, %cst_11 [1] : vector<4x40x512xf32> to vector<4x512xf32>
    %23 = vector.shape_cast %22 : vector<4x512xf32> to vector<4x1x512xf32>
    %24 = tpu.reciprocal %23 {approx = true} : vector<4x1x512xf32> -> vector<4x1x512xf32>
    %25 = vector.broadcast %24 : vector<4x1x512xf32> to vector<4x40x512xf32>
    %26 = arith.mulf %21, %25 : vector<4x40x512xf32>
    %27 = arith.truncf %26 : vector<4x40x512xf32> to vector<4x40x512xbf16>
    %28 = vector.shape_cast %27 : vector<4x40x512xbf16> to vector<160x512xbf16>
    %cst_12 = arith.constant dense<0.000000e+00> : vector<4x512xf32>
    %29 = tpu.matmul %6, %28, %cst_12 {dimension_numbers = #tpu.dot_dimension_numbers<[1], [0], [0], [1], [0, 0, 1, 1], [], []>} : vector<4x160xbf16>, vector<160x512xbf16>, vector<4x512xf32> -> vector<4x512xf32>
    %30 = vector.extract_strided_slice %29 {offsets = [0, 0], sizes = [4, 128], strides = [1, 1]} : vector<4x512xf32> to vector<4x128xf32>
    %31 = vector.extract_strided_slice %29 {offsets = [0, 128], sizes = [4, 128], strides = [1, 1]} : vector<4x512xf32> to vector<4x128xf32>
    %32 = arith.addf %30, %31 : vector<4x128xf32>
    %33 = vector.extract_strided_slice %29 {offsets = [0, 256], sizes = [4, 128], strides = [1, 1]} : vector<4x512xf32> to vector<4x128xf32>
    %34 = arith.addf %32, %33 : vector<4x128xf32>
    %35 = vector.extract_strided_slice %29 {offsets = [0, 384], sizes = [4, 128], strides = [1, 1]} : vector<4x512xf32> to vector<4x128xf32>
    %36 = arith.addf %34, %35 : vector<4x128xf32>
    %c0_13 = arith.constant 0 : index
    %c0_14 = arith.constant 0 : index
    %c0_15 = arith.constant 0 : index
    %c0_16 = arith.constant 0 : index
    %37 = vector.load %arg5[%c0_13, %c0_14, %c0_15, %c0_16] : memref<1x1x4x128xf32, #tpu.memory_space<vmem>>, vector<1x1x4x128xf32>
    %38 = vector.shape_cast %37 : vector<1x1x4x128xf32> to vector<4x128xf32>
    %39 = vector.shape_cast %36 : vector<4x128xf32> to vector<1x1x4x128xf32>
    tpu.vector_store %arg5[%c0_13, %c0_14, %c0_15, %c0_16], %39 {strides = array<i32>} : memref<1x1x4x128xf32, #tpu.memory_space<vmem>>, vector<1x1x4x128xf32>,
    return
  }
  func.func @transform_0(%arg0: i32, %arg1: i32, %arg2: i32) -> (i32, i32, i32, i32, i32) {
    %c0_i32 = arith.constant 0 : i32
    %c0_i32_0 = arith.constant 0 : i32
    %c0_i32_1 = arith.constant 0 : i32
    return %arg0, %arg1, %c0_i32, %c0_i32_0, %arg2 : i32, i32, i32, i32, i32
  }
  func.func @transform_1(%arg0: i32, %arg1: i32, %arg2: i32) -> (i32, i32, i32, i32) {
    %c0_i32 = arith.constant 0 : i32
    %c0_i32_0 = arith.constant 0 : i32
    %c0_i32_1 = arith.constant 0 : i32
    return %arg0, %arg1, %c0_i32, %c0_i32_0 : i32, i32, i32, i32
  }
  func.func @transform_2(%arg0: i32, %arg1: i32, %arg2: i32) -> (i32, i32, i32, i32) {
    %c0_i32 = arith.constant 0 : i32
    %c0_i32_0 = arith.constant 0 : i32
    return %arg0, %arg1, %c0_i32, %arg2 : i32, i32, i32, i32
  }
}

</mosaic_0001>

<bundles_post_ra>
// kernel: conv_attention3d_forward.1
= control target key start
LH: loop header
LB: loop body
LE: loop exit
PB: predicated region body
PF: predicated region fallthrough
CT: control target
= control target key end

     0   :  { %s2180_s9 = smov 0   ;;  %s2182_s10 = smov 0   ;;  %s3159_s0 = inlined_call_operand.vmem [shape: bf16[2,2,4,4,128], index: 0, kind: input, shape index: {}]   ;;  %s3160_s1 = inlined_call_operand.vmem [shape: bf16[2,2,8,160], index: 1, kind: input, shape index: {}]   ;;  %s3161_s2 = inlined_call_operand.vmem [shape: f32[2,2,4,128], index: 2, kind: output, shape index: {}]  }
   0x1   :  { %s2184_s11 = smov 0   ;;  %s2186_s12 = smov 0  }
   0x2   :  { %s2188_s13 = smov 0  }
   0x3 LB: > { %s27_s14 = sadd.s32 1, %s2153_s11  ;;  %s31_s15 = sadd.s32 1, %s2157_s12  ;;  %s2161_s13 = sphi %s2188_s13, %s12_s13   ;;  %s2157_s12 = sphi %s2186_s12, %s3382_s12   ;;  %s2153_s11 = sphi %s2184_s11, %s3381_s11   ;;  %s2149_s10 = sphi %s2182_s10, %s3380_s10   ;;  %s2145_s9 = sphi %s2180_s9, %s3379_s9  }
   0x4   : > { %p29_p0 = scmp.ge.s32.totalorder %s27_s14, 2  ;;  %p1833_p1 = scmp.ge.s32.totalorder %s2161_s13, 1 }
   0x5   : > { %p162_p2 = scmp.lt.s32.totalorder %s2161_s13, 5 }
   0x6   : > { %s3384_s14 = smov (%p29_p0, %s27_s14), 0  ;;  %s3386_s15 = smov (!%p29_p0, %s31_s15), %s2157_s12 }
   0x7   : > { %p163_p3 = pnand %p1833_p1, %p162_p2  ;;  %p33_p4 = scmp.ge.s32.totalorder %s3386_s15, 2 }
   0x9   : > { %s3388_s15 = smov (%p33_p4, %s3386_s15), 0  ;;  %166 = sbr.rel (%p163_p3) target bundleno = 784 (0x310), region = 28 }
  0x10   : > { %p206_p5 = scmp.lt.s32.totalorder %s2149_s10, 1  ;;  %p208_p6 = scmp.lt.s32.totalorder %s2145_s9, 1  ;;  %v2163_v0 = vmov 0   ;;  %vm323_vm0 = vcmask 1041408   ;;  %vm292_vm1 = vcmask 31744   ;;  %v602_v24 = vlaneseq }
  0x11   : > { %368 = vmatprep.mubr.bf16.mxu0 %v2163_v0  ;;  %501 = vmatprep.mubr.bf16.mxu1 %v2163_v0  ;;  %v2164_v55 = vmov -1e+30   ;;  %vm1613_vm3 = vcmask 261120  }
  0x12   : > { %s3390_s10 = smov (!%p206_p5, %s2149_s10), 1  ;;  %s3392_s9 = smov (!%p208_p6, %s2145_s9), 1  ;;  %v603_v35 = vshrl.u32 %v602_v24, 7 }
  0x13   : > { %s1838_s16 = sshll.u32 %s3390_s10, 2  ;;  %s1835_s17 = sshll.u32 %s3390_s10, 3 }
  0x14   : > { %s1837_s18 = sshll.u32 %s3392_s9, 1  ;;  %s1834_s19 = sshll.u32 %s3392_s9, 2  ;;  %v607_v38 = vadd.s32 32, %v603_v35 }
  0x15   : > { %s224_s20 = sadd.s32 %s1838_s16, %s1837_s18  ;;  %s215_s21 = sadd.s32 %s1835_s17, %s1834_s19 }
  0x16   : > { %s1839_s22 = sshll.u32 %s224_s20, 2  ;;  %s1836_s23 = sshll.u32 %s215_s21, 1  ;;  %vm612_vm2 = vcmp.lt.s32.totalorder %v607_v38, 36 }
  0x17   : > { %s226_s26 = scalar_lea.vmem %s3160_s1, %s1839_s22  ;;  %s217_s29 = scalar_lea.vmem %s3159_s0, %s1836_s23  ;;  %v2318_v56 = vsel %vm612_vm2, 0.0, %v2164_v55 }
  0x18   : > { %v252_v1 = vld [vmem:[%s226_s26] sm:$0xff]  ;;  %s1840_s30 = sshll.u32 %s3390_s10, 1 }
  0x19   : > { %v239_v2 = vld [vmem:[%s217_s29] ss:$2 sm:$0xf]  ;;  %v2226_v3 = vcombine.low %v252_v1, %v252_v1  ;;  %v1842_v5 = vld [vmem:[%s217_s29 + $0x1] ss:$2 sm:$0xf]  ;;  %v2229_v13 = vcombine.high %v252_v1, %v252_v1  ;;  %s235_s3 = sadd.s32 %s1840_s30, %s3392_s9 }
  0x1a   : > { %v240_v4 = vshrl.u32 %v239_v2, 16  ;;  %v244_v6 = vpack.c.b16 %v239_v2, %v239_v2  ;;  %v243_v7 = vshrl.u32 %v1842_v5, 16  ;;  %v246_v8 = vpack.c.b16 %v1842_v5, %v1842_v5  ;;  %s1841_s4 = sshll.u32 %s235_s3, 2 }
  0x1b   : > { %3233 = vst [vmem:[#allocation2_spill] sm:$0xff] %v2226_v3  ;;  %260 = vxpose.xlu0.c.b16.start.end [1/1] (short) %v2226_v3, 128  ;;  %3234 = vst [vmem:[#allocation3_spill] sm:$0xff] %v2229_v13  ;;  %s237_s7 = scalar_lea.vmem %s3161_s2, %s1841_s4 }
  0x1c   : > { %v245_v9 = vpack.c.b16 %v240_v4, %v240_v4  ;;  %v325_v10 = vsel %vm323_vm0, %v244_v6, 0  ;;  %v247_v11 = vpack.c.b16 %v243_v7, %v243_v7  ;;  %v331_v12 = vsel %vm323_vm0, %v246_v8, 0 }
  0x1e   : > { %1845 = vmatprep.subr.msk.bf16.mxu0 %vm323_vm0, %v245_v9  ;;  %1856 = vmatprep.subr.msk.bf16.mxu1 %vm323_vm0, %v247_v11 }
  0x1f   : > { %337 = vmatpush1.bf16.msra.mxu0 %v325_v10  ;;  %470 = vmatpush1.bf16.msra.mxu1 %v331_v12 }
  0x38   : > { %276 = vxpose.xlu0.c.b16.start.end [1/1] (short) (narrow) %v2229_v13, 32 }
  0x81   : > { %v268_v14 = vpop.trf.xlu0 }
  0x82   : > { %1846 = vmatmul.mubr.msk.bf16.vlgmr.msra.gmra.mrb[0].mxu0 %vm292_vm1, %v268_v14  ;;  %1857 = vmatmul.mubr.msk.bf16.vlgmr.msra.gmra.mrb[0].mxu1 %vm292_vm1, %v268_v14 }
  0x83   : > { %378 = vmatprep.mubr.bf16.mxu0 %v2163_v0  ;;  %511 = vmatprep.mubr.bf16.mxu1 %v2163_v0 }
  0x85   : > { %v269_v15 = vpop.trf.xlu0 }
  0x89   : > { %v270_v16 = vpop.trf.xlu0 }
  0x8a   : > { %1847 = vmatmul.mubr.msk.bf16.gmra.mrb[4].mxu0 %vm292_vm1, %v269_v15  ;;  %1858 = vmatmul.mubr.msk.bf16.gmra.mrb[4].mxu1 %vm292_vm1, %v269_v15 }
  0x8b   : > { %388 = vmatprep.mubr.bf16.mxu0 %v2163_v0  ;;  %521 = vmatprep.mubr.bf16.mxu1 %v2163_v0 }
  0x8d   : > { %v271_v17 = vpop.trf.xlu0 }
  0x91   : > { %v272_v18 = vpop.trf.xlu0 }
  0x92   : > { %1848 = vmatmul.mubr.msk.bf16.gmra.mrb[8].mxu0 %vm292_vm1, %v270_v16  ;;  %1859 = vmatmul.mubr.msk.bf16.gmra.mrb[8].mxu1 %vm292_vm1, %v270_v16 }
  0x93   : > { %398 = vmatprep.mubr.bf16.mxu0 %v2163_v0  ;;  %531 = vmatprep.mubr.bf16.mxu1 %v2163_v0 }
  0x95   : > { %v273_v19 = vpop.trf.xlu0 }
  0x99   : > { %v274_v20 = vpop.trf.xlu0 }
  0x9a   : > { %1849 = vmatmul.mubr.msk.bf16.gmra.mrb[12].mxu0 %vm292_vm1, %v271_v17  ;;  %1860 = vmatmul.mubr.msk.bf16.gmra.mrb[12].mxu1 %vm292_vm1, %v271_v17 }
  0x9b   : > { %408 = vmatprep.mubr.bf16.mxu0 %v2163_v0  ;;  %541 = vmatprep.mubr.bf16.mxu1 %v2163_v0 }
  0x9d   : > { %v275_v21 = vpop.trf.xlu0 }
  0xa1   : > { %v284_v22 = vpop.trf.xlu0 }
  0xa2   : > { %1850 = vmatmul.mubr.msk.bf16.gmra.mrb[16].mxu0 %vm292_vm1, %v272_v18  ;;  %1861 = vmatmul.mubr.msk.bf16.gmra.mrb[16].mxu1 %vm292_vm1, %v272_v18 }
  0xa3   : > { %418 = vmatprep.mubr.bf16.mxu0 %v2163_v0  ;;  %551 = vmatprep.mubr.bf16.mxu1 %v2163_v0 }
  0xa5   : > { %v285_v23 = vpop.trf.xlu0 }
  0xaa   : > { %1851 = vmatmul.mubr.msk.bf16.gmra.mrb[20].mxu0 %vm292_vm1, %v273_v19  ;;  %1862 = vmatmul.mubr.msk.bf16.gmra.mrb[20].mxu1 %vm292_vm1, %v273_v19 }
  0xab   : > { %428 = vmatprep.mubr.bf16.mxu0 %v2163_v0  ;;  %561 = vmatprep.mubr.bf16.mxu1 %v2163_v0 }
  0xb2   : > { %1852 = vmatmul.mubr.msk.bf16.gmra.mrb[24].mxu0 %vm292_vm1, %v274_v20  ;;  %1863 = vmatmul.mubr.msk.bf16.gmra.mrb[24].mxu1 %vm292_vm1, %v274_v20 }
  0xb3   : > { %438 = vmatprep.mubr.bf16.mxu0 %v2163_v0  ;;  %571 = vmatprep.mubr.bf16.mxu1 %v2163_v0 }
  0xba   : > { %1853 = vmatmul.mubr.msk.bf16.gmra.mrb[28].mxu0 %vm292_vm1, %v275_v21  ;;  %1864 = vmatmul.mubr.msk.bf16.gmra.mrb[28].mxu1 %vm292_vm1, %v275_v21 }
  0xbb   : > { %448 = vmatprep.mubr.bf16.mxu0 %v2163_v0  ;;  %581 = vmatprep.mubr.bf16.mxu1 %v2163_v0 }
  0xc2   : > { %1854 = vmatmul.mubr.msk.bf16.gmra.mrb[32].mxu0 %vm292_vm1, %v284_v22  ;;  %1865 = vmatmul.mubr.msk.bf16.gmra.mrb[32].mxu1 %vm292_vm1, %v284_v22 }
  0xc3   : > { %458 = vmatprep.mubr.bf16.mxu0 %v2163_v0  ;;  %591 = vmatprep.mubr.bf16.mxu1 %v2163_v0 }
  0xca   : > { %1855 = vmatmul.mubr.msk.bf16.gmra.mrb[36].mxu0 %vm292_vm1, %v285_v23  ;;  %1866 = vmatmul.mubr.msk.bf16.gmra.mrb[36].mxu1 %vm292_vm1, %v285_v23 }
 0x155   : > { %v2270_v25 = vpop.f32.mrb[0].mxu0  ;;  %v2272_v26 = vpop.f32.mrb[0].mxu1 }
 0x156   : > { %v2274_v27 = vpop.f32.mrb[1].mxu0  ;;  %v2276_v28 = vpop.f32.mrb[1].mxu1 }
 0x157   : > { %v2278_v29 = vpop.f32.mrb[2].mxu0  ;;  %v2280_v30 = vpop.f32.mrb[2].mxu1 }
 0x158   : > { %v698_v31 = vmax.f32 %v2270_v25, %v2278_v29  ;;  %v718_v32 = vmax.f32 %v2272_v26, %v2280_v30  ;;  %v2286_v33 = vpop.f32.mrb[3].mxu0  ;;  %v2288_v34 = vpop.f32.mrb[3].mxu1 }
 0x159   : > { %v708_v36 = vmax.f32 %v2274_v27, %v2286_v33  ;;  %v728_v37 = vmax.f32 %v2276_v28, %v2288_v34 }
 0x15d   : > { %v2294_v39 = vpop.f32.mrb[4].mxu0  ;;  %v2296_v40 = vpop.f32.mrb[4].mxu1 }
 0x15e   : > { %v699_v41 = vmax.f32 %v698_v31, %v2294_v39  ;;  %v719_v42 = vmax.f32 %v718_v32, %v2296_v40  ;;  %v2300_v43 = vpop.f32.mrb[5].mxu0  ;;  %v2302_v44 = vpop.f32.mrb[5].mxu1 }
 0x15f   : > { %v709_v45 = vmax.f32 %v708_v36, %v2300_v43  ;;  %v729_v46 = vmax.f32 %v728_v37, %v2302_v44  ;;  %v2306_v47 = vpop.f32.mrb[6].mxu0  ;;  %v2308_v48 = vpop.f32.mrb[6].mxu1 }
 0x160   : > { %v700_v49 = vmax.f32 %v699_v41, %v2306_v47  ;;  %v720_v50 = vmax.f32 %v719_v42, %v2308_v48  ;;  %v2312_v51 = vpop.f32.mrb[7].mxu0  ;;  %v2314_v52 = vpop.f32.mrb[7].mxu1 }
 0x161   : > { %v710_v53 = vmax.f32 %v709_v45, %v2312_v51  ;;  %v730_v54 = vmax.f32 %v729_v46, %v2314_v52 }
 0x165   : > { %v390_v57 = vpop.f32.mrb[8].mxu0  ;;  %v523_v58 = vpop.f32.mrb[8].mxu1 }
 0x166   : > { %v2321_v59 = vadd.f32 %v2318_v56, %v390_v57  ;;  %v2324_v60 = vadd.f32 %v2318_v56, %v523_v58  ;;  %v392_v61 = vpop.f32.mrb[9].mxu0  ;;  %v525_v62 = vpop.f32.mrb[9].mxu1 }
 0x167   : > { %v2327_v63 = vadd.f32 %v2318_v56, %v392_v61  ;;  %v2330_v0 = vadd.f32 %v2318_v56, %v525_v62  ;;  %v2332_v1 = vpop.f32.mrb[10].mxu0  ;;  %v2334_v2 = vpop.f32.mrb[10].mxu1 }
 0x168   : > { %v701_v4 = vmax.f32 %v700_v49, %v2321_v59  ;;  %v721_v5 = vmax.f32 %v720_v50, %v2324_v60  ;;  %v2338_v6 = vpop.f32.mrb[11].mxu0  ;;  %v2340_v7 = vpop.f32.mrb[11].mxu1 }
 0x169   : > { %v711_v8 = vmax.f32 %v710_v53, %v2327_v63  ;;  %v731_v9 = vmax.f32 %v730_v54, %v2330_v0 }
 0x16a   : > { %v702_v10 = vrot.slane %v701_v4, 4  ;;  %v722_v11 = vrot.slane %v721_v5, 4 }
 0x16b   : > { %v712_v12 = vrot.slane %v711_v8, 4  ;;  %v732_v14 = vrot.slane %v731_v9, 4 }
 0x16c   : > { %v703_v15 = vmax.f32 %v701_v4, %v702_v10  ;;  %v723_v16 = vmax.f32 %v721_v5, %v722_v11 }
 0x16d   : > { %v713_v17 = vmax.f32 %v711_v8, %v712_v12  ;;  %v733_v18 = vmax.f32 %v731_v9, %v732_v14  ;;  %v2344_v19 = vpop.f32.mrb[12].mxu0  ;;  %v2346_v20 = vpop.f32.mrb[12].mxu1 }
 0x16e   : > { %v704_v21 = vrot.slane %v703_v15, 2  ;;  %v724_v22 = vrot.slane %v723_v16, 2  ;;  %v738_v23 = vmax.f32 %v2332_v1, %v2344_v19  ;;  %v758_v24 = vmax.f32 %v2334_v2, %v2346_v20  ;;  %v2352_v31 = vpop.f32.mrb[13].mxu0  ;;  %v2354_v32 = vpop.f32.mrb[13].mxu1 }
 0x16f   : > { %v714_v35 = vrot.slane %v713_v17, 2  ;;  %v734_v36 = vrot.slane %v733_v18, 2  ;;  %v748_v37 = vmax.f32 %v2338_v6, %v2352_v31  ;;  %v768_v38 = vmax.f32 %v2340_v7, %v2354_v32  ;;  %v2360_v41 = vpop.f32.mrb[14].mxu0  ;;  %v2362_v42 = vpop.f32.mrb[14].mxu1 }
 0x170   : > { %v705_v45 = vmax.f32 %v703_v15, %v704_v21  ;;  %v725_v46 = vmax.f32 %v723_v16, %v724_v22  ;;  %v2365_v49 = vmax.f32 %v738_v23, %v2360_v41  ;;  %v2368_v50 = vmax.f32 %v758_v24, %v2362_v42  ;;  %v2370_v53 = vpop.f32.mrb[15].mxu0  ;;  %v2372_v54 = vpop.f32.mrb[15].mxu1 }
 0x171   : > { %v715_v55 = vmax.f32 %v713_v17, %v714_v35  ;;  %v735_v57 = vmax.f32 %v733_v18, %v734_v36  ;;  %v2375_v58 = vmax.f32 %v748_v37, %v2370_v53  ;;  %v2378_v61 = vmax.f32 %v768_v38, %v2372_v54 }
 0x172   : > { %v706_v62 = vrot.slane %v705_v45, 1  ;;  %v726_v4 = vrot.slane %v725_v46, 1 }
 0x173   : > { %v716_v5 = vrot.slane %v715_v55, 1  ;;  %v736_v8 = vrot.slane %v735_v57, 1 }
 0x174   : > { %v707_v9 = vmax.f32 %v705_v45, %v706_v62  ;;  %v727_v10 = vmax.f32 %v725_v46, %v726_v4 }
 0x175   : > { %v717_v12 = vmax.f32 %v715_v55, %v716_v5  ;;  %v2381_v14 = vmax.f32 %v735_v57, %v736_v8  ;;  %v2383_v15 = vpop.f32.mrb[16].mxu0  ;;  %v2385_v16 = vpop.f32.mrb[16].mxu1 }
 0x176   : > { %v858_v17 = vsub.f32 %v2270_v25, %v707_v9  ;;  %v862_v18 = vsub.f32 %v2278_v29, %v707_v9  ;;  %v866_v21 = vsub.f32 %v2294_v39, %v707_v9  ;;  %v870_v22 = vsub.f32 %v2306_v47, %v707_v9  ;;  %v2391_v23 = vpop.f32.mrb[17].mxu0  ;;  %v2393_v24 = vpop.f32.mrb[17].mxu1 }
 0x177   : > { %v874_v35 = vsub.f32 %v2321_v59, %v707_v9  ;;  %v860_v36 = vsub.f32 %v2272_v26, %v727_v10  ;;  %v864_v37 = vsub.f32 %v2280_v30, %v727_v10  ;;  %v868_v38 = vsub.f32 %v2296_v40, %v727_v10  ;;  %v414_v45 = vpop.f32.mrb[18].mxu0  ;;  %v547_v25 = vpop.f32.mrb[18].mxu1 }
 0x178   : > { %v938_v46 = vmul.f32 1.442695, %v858_v17  ;;  %v946_v29 = vmul.f32 1.442695, %v862_v18  ;;  %v954_v55 = vmul.f32 1.442695, %v866_v21  ;;  %v872_v39 = vsub.f32 %v2308_v48, %v727_v10 }
 0x179   : > { %v962_v47 = vmul.f32 1.442695, %v870_v22  ;;  %v970_v57 = vmul.f32 1.442695, %v874_v35  ;;  %v876_v62 = vsub.f32 %v2324_v60, %v727_v10  ;;  %v942_v4 = vmul.f32 1.442695, %v860_v36 }
 0x17a   : > { %1931 = vpow2.f32 %v938_v46  ;;  %v950_v59 = vmul.f32 1.442695, %v864_v37  ;;  %v958_v5 = vmul.f32 1.442695, %v868_v38  ;;  %v966_v26 = vmul.f32 1.442695, %v872_v39 }
 0x17b   : > { %1933 = vpow2.f32 %v946_v29  ;;  %v974_v30 = vmul.f32 1.442695, %v876_v62  ;;  %v859_v40 = vsub.f32 %v2274_v27, %v717_v12  ;;  %v863_v8 = vsub.f32 %v2286_v33, %v717_v12  ;;  %v416_v9 = vpop.f32.mrb[19].mxu0  ;;  %v549_v17 = vpop.f32.mrb[19].mxu1 }
 0x17c   : > { %1935 = vpow2.f32 %v954_v55  ;;  %v867_v48 = vsub.f32 %v2300_v43, %v717_v12  ;;  %v871_v18 = vsub.f32 %v2312_v51, %v717_v12  ;;  %v875_v60 = vsub.f32 %v2327_v63, %v717_v12 }
 0x17d   : > { %1937 = vpow2.f32 %v962_v47  ;;  %v940_v10 = vmul.f32 1.442695, %v859_v40  ;;  %v948_v21 = vmul.f32 1.442695, %v863_v8  ;;  %v861_v22 = vsub.f32 %v2276_v28, %v2381_v14  ;;  %v2408_v35 = vpop.f32.mrb[20].mxu0  ;;  %v2410_v27 = vpop.f32.mrb[20].mxu1 }
 0x17e   : > { %3235 = vst [vmem:[#allocation4_spill] sm:$0xff] %v2408_v35  ;;  %3236 = vst [vmem:[#allocation5_spill] sm:$0xff] %v2410_v27  ;;  %1939 = vpow2.f32 %v970_v57  ;;  %v956_v33 = vmul.f32 1.442695, %v867_v48  ;;  %v964_v36 = vmul.f32 1.442695, %v871_v18  ;;  %v865_v43 = vsub.f32 %v2288_v34, %v2381_v14 }
 0x17f   : > { %v972_v37 = vmul.f32 1.442695, %v875_v60  ;;  %1941 = vpow2.f32 %v942_v4  ;;  %v869_v51 = vsub.f32 %v2302_v44, %v2381_v14  ;;  %v873_v63 = vsub.f32 %v2314_v52, %v2381_v14  ;;  %v2418_v12 = vpop.f32.mrb[21].mxu0  ;;  %v2420_v28 = vpop.f32.mrb[21].mxu1 }
 0x180   : > { %3237 = vst [vmem:[#allocation6_spill] sm:$0xff] %v2418_v12  ;;  %1943 = vpow2.f32 %v950_v59  ;;  %v877_v38 = vsub.f32 %v2330_v0, %v2381_v14  ;;  %v944_v46 = vmul.f32 1.442695, %v861_v22  ;;  %v740_v29 = vmax.f32 %v2365_v49, %v2383_v15  ;;  %v2426_v55 = vpop.f32.mrb[22].mxu0  ;;  %v2428_v34 = vpop.f32.mrb[22].mxu1 }
 0x181   : > { %3238 = vst [vmem:[#allocation7_spill] sm:$0xff] %v2426_v55  ;;  %3239 = vst [vmem:[#allocation8_spill] sm:$0xff] %v2428_v34  ;;  %1945 = vpow2.f32 %v958_v5  ;;  %v952_v44 = vmul.f32 1.442695, %v865_v43  ;;  %v960_v39 = vmul.f32 1.442695, %v869_v51  ;;  %v760_v57 = vmax.f32 %v2368_v50, %v2385_v16 }
 0x182   : > { %v968_v52 = vmul.f32 1.442695, %v873_v63  ;;  %1947 = vpow2.f32 %v966_v26  ;;  %v2430_v47 = vmul.f32 1.442695, %v877_v38  ;;  %v750_v0 = vmax.f32 %v2375_v58, %v2391_v23  ;;  %v2436_v14 = vpop.f32.mrb[23].mxu0  ;;  %v2438_v49 = vpop.f32.mrb[23].mxu1 }
 0x183   : > { %3240 = vst [vmem:[#allocation9_spill] sm:$0xff] %v2436_v14  ;;  %1949 = vpow2.f32 %v974_v30  ;;  %v770_v62 = vmax.f32 %v2378_v61, %v2393_v24  ;;  %v2443_v4 = vadd.f32 %v2318_v56, %v414_v45  ;;  %v2446_v59 = vadd.f32 %v2318_v56, %v547_v25 }
 0x184   : > { %v2448_v5 = vpop.eup %1931  ;;  %1951 = vpow2.f32 %v940_v10  ;;  %v2451_v50 = vadd.f32 %v2318_v56, %v416_v9  ;;  %v2454_v58 = vadd.f32 %v2318_v56, %v549_v17  ;;  %v778_v26 = vmax.f32 %v2408_v35, %v2426_v55 }
 0x185   : > { %3241 = vst [vmem:[#allocation10_spill] sm:$0xff] %v2448_v5  ;;  %v2458_v30 = vpop.eup %1933  ;;  %1953 = vpow2.f32 %v948_v21  ;;  %v741_v61 = vmax.f32 %v740_v29, %v2443_v4  ;;  %v761_v45 = vmax.f32 %v760_v57, %v2446_v59  ;;  %v798_v25 = vmax.f32 %v2410_v27, %v2428_v34  ;;  %v2464_v40 = vpop.f32.mrb[24].mxu0 }
 0x186   : > { %3242 = vst [vmem:[#allocation11_spill] sm:$0xff] %v2458_v30  ;;  %3243 = vst [vmem:[#allocation12_spill] sm:$0xff] %v2464_v40  ;;  %v2466_v8 = vpop.f32.mrb[24].mxu1  ;;  %v2468_v9 = vpop.eup %1935  ;;  %v1098_v17 = vadd.f32 %v2458_v30, %v2448_v5  ;;  %1955 = vpow2.f32 %v956_v33  ;;  %v751_v48 = vmax.f32 %v750_v0, %v2451_v50  ;;  %v771_v18 = vmax.f32 %v770_v62, %v2454_v58 }
 0x187   : > { %3244 = vst [vmem:[#allocation13_spill] sm:$0xff] %v2466_v8  ;;  %3245 = vst [vmem:[#allocation14_spill] sm:$0xff] %v2468_v9  ;;  %v2474_v60 = vpop.f32.mrb[25].mxu0  ;;  %v2476_v10 = vpop.f32.mrb[25].mxu1  ;;  %1957 = vpow2.f32 %v964_v36  ;;  %v742_v22 = vrot.slane %v741_v61, 4  ;;  %v762_v43 = vrot.slane %v761_v45, 4  ;;  %v788_v51 = vmax.f32 %v2418_v12, %v2436_v14 }
 0x188   : > { %3246 = vst [vmem:[#allocation15_spill] sm:$0xff] %v2474_v60  ;;  %v2478_v21 = vpop.eup %1937  ;;  %v2482_v63 = vpop.f32.mrb[26].mxu0  ;;  %v1099_v29 = vadd.f32 %v2468_v9, %v1098_v17  ;;  %1959 = vpow2.f32 %v972_v37  ;;  %v752_v57 = vrot.slane %v751_v48, 4  ;;  %v772_v0 = vrot.slane %v771_v18, 4 }
 0x189   : > { %3247 = vst [vmem:[#allocation16_spill] sm:$0xff] %v2478_v21  ;;  %v2484_v38 = vpop.f32.mrb[26].mxu1  ;;  %v2486_v33 = vpop.eup %1939  ;;  %1961 = vpow2.f32 %v944_v46  ;;  %v743_v3 = vmax.f32 %v741_v61, %v742_v22  ;;  %v763_v13 = vmax.f32 %v761_v45, %v762_v43 }
 0x18a   : > { %3248 = vst [vmem:[#allocation17_spill] sm:$0xff] %v2486_v33  ;;  %v2489_v62 = vpop.f32.mrb[27].mxu0  ;;  %v2491_v11 = vpop.f32.mrb[27].mxu1  ;;  %v1100_v14 = vadd.f32 %v2478_v21, %v1099_v29  ;;  %1963 = vpow2.f32 %v952_v44  ;;  %v753_v37 = vmax.f32 %v751_v48, %v752_v57  ;;  %v773_v17 = vmax.f32 %v771_v18, %v772_v0 }
 0x18b   : > { %v2493_v36 = vpop.eup %1941  ;;  %1965 = vpow2.f32 %v960_v39  ;;  %v744_v34 = vrot.slane %v743_v3, 2  ;;  %v764_v46 = vrot.slane %v763_v13, 2 }
 0x18c   : > { %3249 = vst [vmem:[#allocation18_spill] sm:$0xff] %v2493_v36  ;;  %v2497_v5 = vpop.eup %1943  ;;  %v1101_v45 = vadd.f32 %v2486_v33, %v1100_v14  ;;  %1967 = vpow2.f32 %v968_v52  ;;  %v754_v22 = vrot.slane %v753_v37, 2  ;;  %v774_v43 = vrot.slane %v773_v17, 2 }
 0x18d   : > { %3250 = vst [vmem:[#allocation19_spill] sm:$0xff] %v2497_v5  ;;  %v2500_v9 = vpop.eup %1945  ;;  %v1118_v12 = vadd.f32 %v2497_v5, %v2493_v36  ;;  %1969 = vpow2.f32 %v2430_v47  ;;  %v745_v48 = vmax.f32 %v743_v3, %v744_v34  ;;  %v765_v18 = vmax.f32 %v763_v13, %v764_v46  ;;  %v2511_v29 = vpop.f32.mrb[28].mxu0 }
 0x18e   : > { %3251 = vst [vmem:[#allocation20_spill] sm:$0xff] %v2500_v9  ;;  %v2504_v61 = vpop.eup %1947  ;;  %v2513_v39 = vpop.f32.mrb[28].mxu1  ;;  %v1102_v0 = vrot.slane %v1101_v45, 4  ;;  %v755_v21 = vmax.f32 %v753_v37, %v754_v22  ;;  %v775_v14 = vmax.f32 %v773_v17, %v774_v43  ;;  %v2518_v52 = vmax.f32 %v778_v26, %v2464_v40 }
 0x18f   : > { %3252 = vst [vmem:[#allocation21_spill] sm:$0xff] %v2504_v61  ;;  %v2507_v30 = vpop.eup %1949  ;;  %v1119_v44 = vadd.f32 %v2500_v9, %v1118_v12  ;;  %v2520_v33 = vpop.f32.mrb[29].mxu0  ;;  %v746_v13 = vrot.slane %v745_v48, 1  ;;  %v766_v34 = vrot.slane %v765_v18, 1  ;;  %v2528_v47 = vmax.f32 %v798_v25, %v2466_v8 }
 0x190   : > { %3253 = vst [vmem:[#allocation22_spill] sm:$0xff] %v2507_v30  ;;  %v2515_v57 = vpop.eup %1951  ;;  %v2522_v5 = vpop.f32.mrb[29].mxu1  ;;  %v1103_v26 = vadd.f32 %v1102_v0, %v1101_v45  ;;  %v756_v43 = vrot.slane %v755_v21, 1  ;;  %v776_v9 = vrot.slane %v775_v14, 1  ;;  %v2548_v40 = vmax.f32 %v788_v51, %v2474_v60 }
 0x191   : > { %3254 = vst [vmem:[#allocation23_spill] sm:$0xff] %v2515_v57  ;;  %v2524_v12 = vpop.eup %1953  ;;  %v1120_v3 = vadd.f32 %v2504_v61, %v1119_v44  ;;  %v2530_v46 = vpop.f32.mrb[30].mxu0  ;;  %v747_v8 = vmax.f32 %v745_v48, %v746_v13  ;;  %v2545_v27 = vmax.f32 %v765_v18, %v766_v34 }
 0x192   : > { %3255 = vst [vmem:[#allocation24_spill] sm:$0xff] %v2524_v12  ;;  %3256 = vst [vmem:[#allocation25_spill] sm:$0xff] %v2530_v46  ;;  %v2532_v37 = vpop.f32.mrb[30].mxu1  ;;  %v2534_v17 = vpop.eup %1955  ;;  %v1108_v22 = vadd.f32 %v2524_v12, %v2515_v57  ;;  %v1104_v0 = vrot.slane %v1103_v26, 2  ;;  %v2553_v57 = vmax.f32 %v755_v21, %v756_v43  ;;  %v2555_v55 = vmax.f32 %v775_v14, %v776_v9 }
 0x193   : > { %3257 = vst [vmem:[#allocation26_spill] sm:$0xff] %v2534_v17  ;;  %v2538_v36 = vpop.f32.mrb[31].mxu0  ;;  %v2540_v44 = vpop.f32.mrb[31].mxu1  ;;  %v1121_v25 = vadd.f32 %v2507_v30, %v1120_v3  ;;  %v878_v3 = vsub.f32 %v2332_v1, %v747_v8  ;;  %v882_v48 = vsub.f32 %v2344_v19, %v747_v8  ;;  %v886_v18 = vsub.f32 %v2360_v41, %v747_v8 }
 0x194   : > { %3258 = vst [vmem:[#allocation27_spill] sm:$0xff] %v2540_v44  ;;  %v2542_v61 = vpop.eup %1957  ;;  %v1109_v12 = vadd.f32 %v2534_v17, %v1108_v22  ;;  %v1105_v13 = vadd.f32 %v1104_v0, %v1103_v26  ;;  %v890_v22 = vsub.f32 %v2383_v15, %v747_v8  ;;  %v894_v21 = vsub.f32 %v2443_v4, %v747_v8 }
 0x195   : > { %3259 = vst [vmem:[#allocation28_spill] sm:$0xff] %v2542_v61  ;;  %v2550_v45 = vpop.eup %1959  ;;  %v1122_v44 = vrot.slane %v1121_v25, 4  ;;  %v978_v1 = vmul.f32 1.442695, %v878_v3  ;;  %v986_v30 = vmul.f32 1.442695, %v882_v48 }
 0x196   : > { %3260 = vst [vmem:[#allocation29_spill] sm:$0xff] %v2550_v45  ;;  %v2557_v35 = vpop.eup %1961  ;;  %v1110_v34 = vadd.f32 %v2542_v61, %v1109_v12  ;;  %v2571_v19 = vpop.f32.mrb[32].mxu0  ;;  %v1106_v26 = vrot.slane %v1105_v13, 1  ;;  %v994_v15 = vmul.f32 1.442695, %v886_v18  ;;  %v880_v18 = vsub.f32 %v2334_v2, %v2545_v27 }
 0x197   : > { %3261 = vst [vmem:[#allocation30_spill] sm:$0xff] %v2557_v35  ;;  %v2562_v51 = vpop.eup %1963  ;;  %v1123_v14 = vadd.f32 %v1122_v44, %v1121_v25  ;;  %3264 = vst [vmem:[#allocation33_spill] sm:$0xff] %v2571_v19  ;;  %v2573_v41 = vpop.f32.mrb[32].mxu1  ;;  %v1002_v0 = vmul.f32 1.442695, %v890_v22  ;;  %1971 = vpow2.f32 %v978_v1  ;;  %v892_v2 = vsub.f32 %v2385_v16, %v2545_v27 }
 0x198   : > { %3262 = vst [vmem:[#allocation31_spill] sm:$0xff] %v2562_v51  ;;  %v2567_v9 = vpop.eup %1965  ;;  %v1128_v43 = vadd.f32 %v2562_v51, %v2557_v35  ;;  %v1111_v12 = vadd.f32 %v2550_v45, %v1110_v34  ;;  %v2578_v4 = vpop.f32.mrb[33].mxu0  ;;  %v1010_v3 = vmul.f32 1.442695, %v894_v21  ;;  %v1107_v51 = vadd.f32 %v1106_v26, %v1105_v13 }
 0x199   : > { %3263 = vst [vmem:[#allocation32_spill] sm:$0xff] %v2567_v9  ;;  %v2575_v17 = vpop.eup %1967  ;;  %v1124_v44 = vrot.slane %v1123_v14, 2  ;;  %v2583_v48 = vpop.f32.mrb[33].mxu1  ;;  %1973 = vpow2.f32 %v986_v30  ;;  %v884_v21 = vsub.f32 %v2346_v20, %v2545_v27  ;;  %v888_v30 = vsub.f32 %v2362_v42, %v2545_v27 }
 0x19a   : > { %3265 = vst [vmem:[#allocation34_spill] sm:$0xff] %v2575_v17  ;;  %v2580_v8 = vpop.eup %1969  ;;  %v1129_v25 = vadd.f32 %v2567_v9, %v1128_v43  ;;  %v2585_v61 = vpop.f32.mrb[34].mxu0  ;;  %v1112_v35 = vrot.slane %v1111_v12, 4  ;;  %1975 = vpow2.f32 %v994_v15  ;;  %v982_v20 = vmul.f32 1.442695, %v880_v18 }
 0x19b   : > { %3266 = vst [vmem:[#allocation35_spill] sm:$0xff] %v2580_v8  ;;  %3267 = vst [vmem:[#allocation36_spill] sm:$0xff] %v2585_v61  ;;  %v2589_v34 = vpop.f32.mrb[34].mxu1  ;;  %v2591_v22 = vpop.f32.mrb[35].mxu0  ;;  %v1125_v45 = vadd.f32 %v1124_v44, %v1123_v14  ;;  %1977 = vrcp.f32 %v1107_v51  ;;  %v896_v14 = vsub.f32 %v2446_v59, %v2545_v27  ;;  %v990_v44 = vmul.f32 1.442695, %v884_v21 }
 0x19c   : > { %v1130_v60 = vadd.f32 %v2575_v17, %v1129_v25  ;;  %v2596_v43 = vpop.f32.mrb[35].mxu1  ;;  %v1113_v13 = vadd.f32 %v1112_v35, %v1111_v12  ;;  %1979 = vpow2.f32 %v1002_v0  ;;  %v998_v35 = vmul.f32 1.442695, %v888_v30 }
 0x19d   : > { %v1126_v1 = vrot.slane %v1125_v45, 1  ;;  %1981 = vpow2.f32 %v1010_v3  ;;  %v1006_v12 = vmul.f32 1.442695, %v892_v2  ;;  %v2605_v17 = vpop.f32.mrb[36].mxu0  ;;  %v1014_v16 = vmul.f32 1.442695, %v896_v14 }
 0x19e   : > { %v1131_v26 = vadd.f32 %v2580_v8, %v1130_v60  ;;  %v1114_v15 = vrot.slane %v1113_v13, 2  ;;  %1983 = vpow2.f32 %v982_v20  ;;  %v879_v60 = vsub.f32 %v2338_v6, %v2553_v57  ;;  %v2609_v0 = vpop.f32.mrb[36].mxu1  ;;  %v2611_v8 = vpop.f32.mrb[37].mxu0 }
 0x19f   : > { %v1127_v25 = vadd.f32 %v1126_v1, %v1125_v45  ;;  %v883_v59 = vsub.f32 %v2352_v31, %v2553_v57  ;;  %v887_v45 = vsub.f32 %v2370_v53, %v2553_v57  ;;  %v2617_v3 = vpop.f32.mrb[37].mxu1  ;;  %v2619_v18 = vpop.f32.mrb[38].mxu0  ;;  %v891_v6 = vsub.f32 %v2391_v23, %v2553_v57 }
 0x1a0   : > { %v1132_v51 = vrot.slane %v1131_v26, 4  ;;  %v1115_v42 = vadd.f32 %v1114_v15, %v1113_v13  ;;  %v895_v13 = vsub.f32 %v2451_v50, %v2553_v57  ;;  %v2625_v30 = vpop.f32.mrb[38].mxu1  ;;  %v2627_v2 = vpop.f32.mrb[39].mxu0  ;;  %v980_v53 = vmul.f32 1.442695, %v879_v60 }
 0x1a1   : > { %1985 = vrcp.f32 %v1127_v25  ;;  %v2629_v31 = vpop.eup %1971  ;;  %v2631_v14 = vpop.f32.mrb[39].mxu1  ;;  %v996_v23 = vmul.f32 1.442695, %v887_v45 }
 0x1a2   : > { %v1133_v27 = vadd.f32 %v1132_v51, %v1131_v26  ;;  %v1116_v21 = vrot.slane %v1115_v42, 1  ;;  %1987 = vpow2.f32 %v990_v44  ;;  %3268 = vst [vmem:[#allocation37_spill] sm:$0xff] %v2629_v31  ;;  %v988_v26 = vmul.f32 1.442695, %v883_v59 }
 0x1a3   : > { %1989 = vpow2.f32 %v998_v35  ;;  %v2633_v15 = vpop.eup %1973  ;;  %v1004_v44 = vmul.f32 1.442695, %v891_v6  ;;  %v1012_v51 = vmul.f32 1.442695, %v895_v13  ;;  %v881_v35 = vsub.f32 %v2340_v7, %v2555_v55 }
 0x1a4   : > { %v1134_v1 = vrot.slane %v1133_v27, 2  ;;  %3269 = vst [vmem:[#allocation38_spill] sm:$0xff] %v2633_v15  ;;  %v1117_v20 = vadd.f32 %v1116_v21, %v1115_v42  ;;  %1991 = vpow2.f32 %v1006_v12  ;;  %v2635_v25 = vpop.eup %1975  ;;  %v1138_v57 = vadd.f32 %v2633_v15, %v2629_v31  ;;  %v3289_v31 = vld [vmem:[#allocation27_spill] sm:$0xff] }
 0x1a5   : > { %3270 = vst [vmem:[#allocation39_spill] sm:$0xff] %v2635_v25  ;;  %1993 = vpow2.f32 %v1014_v16  ;;  %v2639_v9 = vpop.eup %1977  ;;  %v885_v42 = vsub.f32 %v2354_v32, %v2555_v55  ;;  %v889_v12 = vsub.f32 %v2372_v54, %v2555_v55  ;;  %v893_v16 = vsub.f32 %v2393_v24, %v2555_v55 }
 0x1a6   : > { %v1135_v50 = vadd.f32 %v1134_v1, %v1133_v27  ;;  %3271 = vst [vmem:[#allocation40_spill] sm:$0xff] %v2639_v9  ;;  %1995 = vrcp.f32 %v1117_v20  ;;  %v2647_v60 = vpop.eup %1979  ;;  %v1139_v59 = vadd.f32 %v2635_v25, %v1138_v57  ;;  %v897_v7 = vsub.f32 %v2454_v58, %v2555_v55 }
 0x1a7   : > { %3272 = vst [vmem:[#allocation41_spill] sm:$0xff] %v2647_v60  ;;  %1997 = vpow2.f32 %v980_v53  ;;  %v2652_v45 = vpop.eup %1981  ;;  %v984_v21 = vmul.f32 1.442695, %v881_v35  ;;  %v992_v32 = vmul.f32 1.442695, %v885_v42  ;;  %v3275_v24 = vmax.f32 %v2420_v28, %v2438_v49 }
 0x1a8   : > { %v1136_v27 = vrot.slane %v1135_v50, 1  ;;  %3273 = vst [vmem:[#allocation42_spill] sm:$0xff] %v2652_v45  ;;  %1999 = vpow2.f32 %v988_v26  ;;  %v1140_v54 = vadd.f32 %v2647_v60, %v1139_v59  ;;  %v1000_v13 = vmul.f32 1.442695, %v889_v12  ;;  %v2657_v1 = vpop.eup %1983 }
 0x1a9   : > { %2001 = vpow2.f32 %v996_v23  ;;  %3274 = vst [vmem:[#allocation43_spill] sm:$0xff] %v2657_v1  ;;  %v1008_v53 = vmul.f32 1.442695, %v893_v16  ;;  %v1016_v20 = vmul.f32 1.442695, %v897_v7  ;;  %v809_v26 = vmax.f32 %v3275_v24, %v2476_v10 }
 0x1aa   : > { %v1137_v6 = vadd.f32 %v1136_v27, %v1135_v50  ;;  %2003 = vpow2.f32 %v1004_v44  ;;  %v1141_v55 = vadd.f32 %v2652_v45, %v1140_v54  ;;  %v780_v58 = vmax.f32 %v2518_v52, %v2482_v63 }
 0x1ab   : > { %v2663_v57 = vpop.eup %1985  ;;  %v800_v23 = vmax.f32 %v2528_v47, %v2484_v38  ;;  %v790_v44 = vmax.f32 %v2548_v40, %v2489_v62  ;;  %v810_v35 = vmax.f32 %v809_v26, %v2491_v11  ;;  %v2677_v42 = vadd.f32 %v2318_v56, %v2511_v29 }
 0x1ac   : > { %3276 = vst [vmem:[#allocation44_spill] sm:$0xff] %v2663_v57  ;;  %2005 = vrcp.f32 %v1137_v6  ;;  %v2670_v50 = vpop.eup %1987  ;;  %v1142_v27 = vrot.slane %v1141_v55, 4  ;;  %v2685_v47 = vadd.f32 %v2318_v56, %v2513_v39  ;;  %v2692_v29 = vadd.f32 %v2318_v56, %v2520_v33 }
 0x1ad   : > { %3277 = vst [vmem:[#allocation45_spill] sm:$0xff] %v2670_v50  ;;  %2007 = vpow2.f32 %v1012_v51  ;;  %v2679_v12 = vpop.eup %1989  ;;  %v1158_v52 = vadd.f32 %v2670_v50, %v2657_v1  ;;  %v781_v40 = vmax.f32 %v780_v58, %v2677_v42  ;;  %v2696_v59 = vadd.f32 %v2318_v56, %v2522_v5 }
 0x1ae   : > { %3278 = vst [vmem:[#allocation46_spill] sm:$0xff] %v2679_v12  ;;  %2009 = vpow2.f32 %v984_v21  ;;  %v2687_v51 = vpop.eup %1991  ;;  %v1143_v7 = vadd.f32 %v1142_v27, %v1141_v55  ;;  %v801_v39 = vmax.f32 %v800_v23, %v2685_v47  ;;  %v791_v54 = vmax.f32 %v790_v44, %v2692_v29 }
 0x1af   : > { %3279 = vst [vmem:[#allocation47_spill] sm:$0xff] %v2687_v51  ;;  %2011 = vpow2.f32 %v992_v32  ;;  %v2698_v16 = vpop.eup %1993  ;;  %v1159_v21 = vadd.f32 %v2679_v12, %v1158_v52  ;;  %v782_v32 = vrot.slane %v781_v40, 4  ;;  %v811_v33 = vmax.f32 %v810_v35, %v2696_v59 }
 0x1b0   : > { %3280 = vst [vmem:[#allocation48_spill] sm:$0xff] %v2698_v16  ;;  %2013 = vpow2.f32 %v1000_v13  ;;  %v2702_v6 = vpop.eup %1995  ;;  %v1144_v5 = vrot.slane %v1143_v7, 2  ;;  %v802_v55 = vrot.slane %v801_v39, 4  ;;  %v792_v27 = vrot.slane %v791_v54, 4 }
 0x1b1   : > { %2015 = vpow2.f32 %v1008_v53  ;;  %v2706_v24 = vpop.eup %1997  ;;  %v1160_v26 = vadd.f32 %v2687_v51, %v1159_v21  ;;  %v783_v13 = vmax.f32 %v781_v40, %v782_v32  ;;  %v812_v23 = vrot.slane %v811_v33, 4 }
 0x1b2   : > { %3281 = vst [vmem:[#allocation49_spill] sm:$0xff] %v2706_v24  ;;  %2017 = vpow2.f32 %v1016_v20  ;;  %v2709_v58 = vpop.eup %1999  ;;  %v818_v53 = vmax.f32 %v2530_v46, %v2571_v19  ;;  %v1145_v44 = vadd.f32 %v1144_v5, %v1143_v7  ;;  %v803_v12 = vmax.f32 %v801_v39, %v802_v55 }
 0x1b3   : > { %3282 = vst [vmem:[#allocation50_spill] sm:$0xff] %v2709_v58  ;;  %v2713_v52 = vpop.eup %2001  ;;  %v1161_v35 = vadd.f32 %v2698_v16, %v1160_v26  ;;  %v1148_v45 = vadd.f32 %v2709_v58, %v2706_v24  ;;  %v784_v20 = vrot.slane %v783_v13, 2  ;;  %v793_v51 = vmax.f32 %v791_v54, %v792_v27 }
 0x1b4   : > { %3283 = vst [vmem:[#allocation51_spill] sm:$0xff] %v2713_v52  ;;  %v2718_v21 = vpop.eup %2003  ;;  %v813_v50 = vmax.f32 %v811_v33, %v812_v23  ;;  %v1146_v60 = vrot.slane %v1145_v44, 1  ;;  %v804_v5 = vrot.slane %v803_v12, 2 }
 0x1b5   : > { %3284 = vst [vmem:[#allocation52_spill] sm:$0xff] %v2718_v21  ;;  %v1162_v25 = vrot.slane %v1161_v35, 4  ;;  %v1149_v7 = vadd.f32 %v2713_v52, %v1148_v45  ;;  %v785_v16 = vmax.f32 %v783_v13, %v784_v20  ;;  %v794_v15 = vrot.slane %v793_v51, 2  ;;  %v3292_v13 = vld [vmem:[#allocation7_spill] sm:$0xff] }
 0x1b6   : > { %v2722_v32 = vpop.eup %2005  ;;  %v814_v39 = vrot.slane %v813_v50, 2  ;;  %v1147_v33 = vadd.f32 %v1146_v60, %v1145_v44  ;;  %v805_v40 = vmax.f32 %v803_v12, %v804_v5 }
 0x1b7   : > { %3285 = vst [vmem:[#allocation53_spill] sm:$0xff] %v2722_v32  ;;  %v2725_v26 = vpop.eup %2007  ;;  %v1163_v27 = vadd.f32 %v1162_v25, %v1161_v35  ;;  %v1150_v23 = vadd.f32 %v2718_v21, %v1149_v7  ;;  %v786_v1 = vrot.slane %v785_v16, 1  ;;  %v795_v45 = vmax.f32 %v793_v51, %v794_v15 }
 0x1b8   : > { %3286 = vst [vmem:[#allocation54_spill] sm:$0xff] %v2725_v26  ;;  %v2729_v54 = vpop.eup %2009  ;;  %v815_v52 = vmax.f32 %v813_v50, %v814_v39  ;;  %2019 = vrcp.f32 %v1147_v33  ;;  %v806_v44 = vrot.slane %v805_v40, 1  ;;  %v2747_v39 = vmax.f32 %v818_v53, %v2585_v61  ;;  %v3291_v33 = vld [vmem:[#allocation4_spill] sm:$0xff] }
 0x1b9   : > { %3287 = vst [vmem:[#allocation55_spill] sm:$0xff] %v2729_v54  ;;  %v2732_v58 = vpop.eup %2011  ;;  %v1164_v24 = vrot.slane %v1163_v27, 2  ;;  %v1151_v55 = vadd.f32 %v2725_v26, %v1150_v23  ;;  %v787_v12 = vmax.f32 %v785_v16, %v786_v1  ;;  %v796_v35 = vrot.slane %v795_v45, 1 }
 0x1ba   : > { %3288 = vst [vmem:[#allocation56_spill] sm:$0xff] %v2732_v58  ;;  %v2736_v20 = vpop.eup %2013  ;;  %v1168_v25 = vadd.f32 %v2732_v58, %v2729_v54  ;;  %v816_v7 = vrot.slane %v815_v52, 1  ;;  %v3293_v58 = vld [vmem:[#allocation12_spill] sm:$0xff] }
 0x1bb   : > { %3290 = vst [vmem:[#allocation27_spill] sm:$0xff] %v2736_v20  ;;  %v2741_v60 = vpop.eup %2015  ;;  %v1165_v50 = vadd.f32 %v1164_v24, %v1163_v27  ;;  %v1152_v51 = vrot.slane %v1151_v55, 4  ;;  %v898_v23 = vsub.f32 %v3291_v33, %v787_v12  ;;  %v902_v26 = vsub.f32 %v3292_v13, %v787_v12 }
 0x1bc   : > { %v2743_v15 = vpop.eup %2017  ;;  %v1169_v5 = vadd.f32 %v2736_v20, %v1168_v25  ;;  %v906_v21 = vsub.f32 %v3293_v58, %v787_v12  ;;  %v910_v1 = vsub.f32 %v2482_v63, %v787_v12  ;;  %v914_v24 = vsub.f32 %v2677_v42, %v787_v12  ;;  %v3294_v58 = vld [vmem:[#allocation5_spill] sm:$0xff]  ;;  %v3295_v63 = vld [vmem:[#allocation8_spill] sm:$0xff] }
 0x1bd   : > { %v1166_v16 = vrot.slane %v1165_v50, 1  ;;  %v1153_v54 = vadd.f32 %v1152_v51, %v1151_v55  ;;  %v1018_v27 = vmul.f32 1.442695, %v898_v23  ;;  %v1026_v9 = vmul.f32 1.442695, %v902_v26 }
 0x1be   : > { %v1170_v57 = vadd.f32 %v2741_v60, %v1169_v5  ;;  %v1034_v25 = vmul.f32 1.442695, %v906_v21  ;;  %v807_v20 = vmax.f32 %v805_v40, %v806_v44  ;;  %v1042_v19 = vmul.f32 1.442695, %v910_v1  ;;  %v3296_v5 = vld [vmem:[#allocation13_spill] sm:$0xff] }
 0x1bf   : > { %v1167_v53 = vadd.f32 %v1166_v16, %v1165_v50  ;;  %v1154_v61 = vrot.slane %v1153_v54, 2  ;;  %2021 = vpow2.f32 %v1018_v27  ;;  %v1050_v13 = vmul.f32 1.442695, %v914_v24 }
 0x1c0   : > { %v1171_v33 = vadd.f32 %v2743_v15, %v1170_v57  ;;  %v900_v46 = vsub.f32 %v3294_v58, %v807_v20  ;;  %v904_v32 = vsub.f32 %v3295_v63, %v807_v20  ;;  %v908_v42 = vsub.f32 %v3296_v5, %v807_v20 }
 0x1c1   : > { %2023 = vrcp.f32 %v1167_v53  ;;  %v1155_v55 = vadd.f32 %v1154_v61, %v1153_v54  ;;  %v912_v21 = vsub.f32 %v2484_v38, %v807_v20  ;;  %v916_v40 = vsub.f32 %v2685_v47, %v807_v20  ;;  %v3299_v20 = vld [vmem:[#allocation6_spill] sm:$0xff] }
 0x1c2   : > { %v1172_v51 = vrot.slane %v1171_v33, 4  ;;  %2025 = vpow2.f32 %v1026_v9  ;;  %v1022_v26 = vmul.f32 1.442695, %v900_v46  ;;  %v2761_v12 = vpop.eup %2019  ;;  %v1030_v50 = vmul.f32 1.442695, %v904_v32 }
 0x1c3   : > { %v1156_v57 = vrot.slane %v1155_v55, 1  ;;  %2027 = vpow2.f32 %v1034_v25  ;;  %v1038_v23 = vmul.f32 1.442695, %v908_v42  ;;  %v1046_v1 = vmul.f32 1.442695, %v912_v21  ;;  %v3300_v25 = vld [vmem:[#allocation9_spill] sm:$0xff] }
 0x1c4   : > { %v1173_v44 = vadd.f32 %v1172_v51, %v1171_v33  ;;  %2029 = vpow2.f32 %v1042_v19  ;;  %v1054_v16 = vmul.f32 1.442695, %v916_v40  ;;  %v797_v24 = vmax.f32 %v795_v45, %v796_v35 }
 0x1c5   : > { %v1157_v61 = vadd.f32 %v1156_v57, %v1155_v55  ;;  %2031 = vpow2.f32 %v1050_v13  ;;  %v817_v9 = vmax.f32 %v815_v52, %v816_v7  ;;  %v3297_v38 = vmax.f32 %v2532_v37, %v2573_v41  ;;  %v3301_v52 = vld [vmem:[#allocation15_spill] sm:$0xff] }
 0x1c6   : > { %v1174_v54 = vrot.slane %v1173_v44, 2  ;;  %2033 = vpow2.f32 %v1022_v26  ;;  %v3298_v47 = vmax.f32 %v2538_v36, %v2578_v4  ;;  %v899_v27 = vsub.f32 %v3299_v20, %v797_v24 }
 0x1c7   : > { %v2767_v46 = vmax.f32 %v3297_v38, %v2589_v34  ;;  %2035 = vrcp.f32 %v1157_v61  ;;  %v903_v45 = vsub.f32 %v3300_v25, %v797_v24  ;;  %v907_v35 = vsub.f32 %v3301_v52, %v797_v24 }
 0x1c8   : > { %v2773_v19 = vmax.f32 %v3298_v47, %v2591_v22  ;;  %v1175_v32 = vadd.f32 %v1174_v54, %v1173_v44  ;;  %2037 = vpow2.f32 %v1030_v50  ;;  %v911_v7 = vsub.f32 %v2489_v62, %v797_v24 }
 0x1c9   : > { %v915_v53 = vsub.f32 %v2692_v29, %v797_v24  ;;  %2039 = vpow2.f32 %v1038_v23  ;;  %v1020_v13 = vmul.f32 1.442695, %v899_v27  ;;  %v1028_v58 = vmul.f32 1.442695, %v903_v45  ;;  %v2780_v63 = vpop.eup %2021 }
 0x1ca   : > { %v1176_v33 = vrot.slane %v1175_v32, 1  ;;  %2041 = vpow2.f32 %v1046_v1  ;;  %v1036_v55 = vmul.f32 1.442695, %v907_v35  ;;  %v1044_v51 = vmul.f32 1.442695, %v911_v7 }
 0x1cb   : > { %v1052_v5 = vmul.f32 1.442695, %v915_v53  ;;  %v2782_v42 = vpop.eup %2023  ;;  %2043 = vpow2.f32 %v1054_v16  ;;  %v901_v40 = vsub.f32 %v2420_v28, %v817_v9  ;;  %v905_v62 = vsub.f32 %v2438_v49, %v817_v9 }
 0x1cc   : > { %v1177_v21 = vadd.f32 %v1176_v33, %v1175_v32  ;;  %v2786_v26 = vpop.eup %2025  ;;  %2045 = vpow2.f32 %v1020_v13  ;;  %v909_v29 = vsub.f32 %v2476_v10, %v817_v9  ;;  %v913_v57 = vsub.f32 %v2491_v11, %v817_v9 }
 0x1cd   : > { %v917_v44 = vsub.f32 %v2696_v59, %v817_v9  ;;  %v2791_v50 = vpop.eup %2027  ;;  %v1178_v23 = vadd.f32 %v2786_v26, %v2780_v63  ;;  %v1024_v1 = vmul.f32 1.442695, %v901_v40  ;;  %v1032_v16 = vmul.f32 1.442695, %v905_v62 }
 0x1ce   : > { %3302 = vst [vmem:[#allocation4_spill] sm:$0xff] %v2791_v50  ;;  %2047 = vrcp.f32 %v1177_v21  ;;  %v2795_v28 = vpop.eup %2029  ;;  %v1040_v49 = vmul.f32 1.442695, %v909_v29  ;;  %v1048_v61 = vmul.f32 1.442695, %v913_v57  ;;  %v3305_v10 = vmax.f32 %v3289_v31, %v2583_v48 }
 0x1cf   : > { %3303 = vst [vmem:[#allocation7_spill] sm:$0xff] %v2795_v28  ;;  %2049 = vpow2.f32 %v1028_v58  ;;  %v1056_v54 = vmul.f32 1.442695, %v917_v44  ;;  %v2797_v24 = vpop.eup %2031  ;;  %v1179_v11 = vadd.f32 %v2791_v50, %v1178_v23  ;;  %v820_v9 = vmax.f32 %v2747_v39, %v2605_v17  ;;  %v3319_v50 = vld [vmem:[#allocation36_spill] sm:$0xff] }
 0x1d0   : > { %3304 = vst [vmem:[#allocation12_spill] sm:$0xff] %v2797_v24  ;;  %2051 = vpow2.f32 %v1036_v55  ;;  %v849_v59 = vmax.f32 %v3305_v10, %v2596_v43  ;;  %v2806_v38 = vpop.eup %2033  ;;  %v840_v47 = vmax.f32 %v2767_v46, %v2609_v0  ;;  %v830_v32 = vmax.f32 %v2773_v19, %v2611_v8 }
 0x1d1   : > { %2053 = vpow2.f32 %v1044_v51  ;;  %v2814_v20 = vadd.f32 %v2318_v56, %v2619_v18  ;;  %v2816_v27 = vpop.eup %2035  ;;  %v1180_v25 = vadd.f32 %v2795_v28, %v1179_v11  ;;  %v2822_v45 = vadd.f32 %v2318_v56, %v2625_v30 }
 0x1d2   : > { %2055 = vpow2.f32 %v1052_v5  ;;  %v850_v39 = vmax.f32 %v849_v59, %v2617_v3  ;;  %v2824_v52 = vpop.eup %2037  ;;  %v2829_v18 = vadd.f32 %v2318_v56, %v2627_v2  ;;  %v2833_v19 = vadd.f32 %v2318_v56, %v2631_v14  ;;  %v3310_v59 = vld [vmem:[#allocation24_spill] sm:$0xff] }
 0x1d3   : > { %2057 = vpow2.f32 %v1024_v1  ;;  %v821_v46 = vmax.f32 %v820_v9, %v2814_v20  ;;  %v2835_v35 = vpop.eup %2039  ;;  %v1181_v7 = vadd.f32 %v2797_v24, %v1180_v25  ;;  %v1198_v30 = vadd.f32 %v2824_v52, %v2806_v38  ;;  %v3309_v1 = vld [vmem:[#allocation23_spill] sm:$0xff] }
 0x1d4   : > { %3306 = vst [vmem:[#allocation5_spill] sm:$0xff] %v2835_v35  ;;  %2059 = vpow2.f32 %v1032_v16  ;;  %v841_v53 = vmax.f32 %v840_v47, %v2822_v45  ;;  %v2841_v33 = vpop.eup %2041  ;;  %v831_v2 = vmax.f32 %v830_v32, %v2829_v18  ;;  %v851_v58 = vmax.f32 %v850_v39, %v2833_v19 }
 0x1d5   : > { %3307 = vst [vmem:[#allocation8_spill] sm:$0xff] %v2841_v33  ;;  %2061 = vpow2.f32 %v1040_v49  ;;  %v822_v13 = vrot.slane %v821_v46, 4  ;;  %v2845_v56 = vpop.eup %2043  ;;  %v1182_v14 = vrot.slane %v1181_v7, 4  ;;  %v1199_v55 = vadd.f32 %v2835_v35, %v1198_v30  ;;  %v3318_v35 = vld [vmem:[#allocation33_spill] sm:$0xff] }
 0x1d6   : > { %3308 = vst [vmem:[#allocation13_spill] sm:$0xff] %v2845_v56  ;;  %2063 = vpow2.f32 %v1048_v61  ;;  %v842_v51 = vrot.slane %v841_v53, 4  ;;  %v2848_v5 = vpop.eup %2045  ;;  %v832_v40 = vrot.slane %v831_v2, 4  ;;  %v852_v62 = vrot.slane %v851_v58, 4 }
 0x1d7   : > { %2065 = vpow2.f32 %v1056_v54  ;;  %v823_v21 = vmax.f32 %v821_v46, %v822_v13  ;;  %v1183_v57 = vadd.f32 %v1182_v14, %v1181_v7  ;;  %v1200_v44 = vadd.f32 %v2841_v33, %v1199_v55 }
 0x1d8   : > { %v2850_v29 = vpop.eup %2047  ;;  %v843_v23 = vmax.f32 %v841_v53, %v842_v51  ;;  %v1275_v16 = vmul.f32 %v2702_v6, %v3309_v1  ;;  %v833_v61 = vmax.f32 %v831_v2, %v832_v40  ;;  %v853_v10 = vmax.f32 %v851_v58, %v852_v62 }
 0x1d9   : > { %v2855_v49 = vpop.eup %2049  ;;  %v824_v11 = vrot.slane %v823_v21, 2  ;;  %v1279_v54 = vmul.f32 %v2702_v6, %v3310_v59  ;;  %v1184_v47 = vrot.slane %v1183_v57, 2  ;;  %v1201_v32 = vadd.f32 %v2845_v56, %v1200_v44  ;;  %v3314_v59 = vld [vmem:[#allocation30_spill] sm:$0xff]  ;;  %v3315_v56 = vld [vmem:[#allocation53_spill] sm:$0xff] }
 0x1da   : > { %v2859_v9 = vpop.eup %2051  ;;  %v1188_v25 = vadd.f32 %v2855_v49, %v2848_v5  ;;  %v844_v39 = vrot.slane %v843_v23, 2  ;;  %v834_v30 = vrot.slane %v833_v61, 2  ;;  %v854_v53 = vrot.slane %v853_v10, 2 }
 0x1db   : > { %3311 = vst [vmem:[#allocation6_spill] sm:$0xff] %v2859_v9  ;;  %v2864_v46 = vpop.eup %2053  ;;  %v825_v7 = vmax.f32 %v823_v21, %v824_v11  ;;  %v1355_v13 = vpack.c.bf16 %v1279_v54, %v1275_v16  ;;  %v1185_v58 = vadd.f32 %v1184_v47, %v1183_v57  ;;  %v1202_v14 = vrot.slane %v1201_v32, 4 }
 0x1dc   : > { %3312 = vst [vmem:[#allocation9_spill] sm:$0xff] %v2864_v46  ;;  %v2866_v2 = vpop.eup %2055  ;;  %v1189_v55 = vadd.f32 %v2859_v9, %v1188_v25  ;;  %v845_v51 = vmax.f32 %v843_v23, %v844_v39  ;;  %v835_v44 = vmax.f32 %v833_v61, %v834_v30  ;;  %v855_v1 = vmax.f32 %v853_v10, %v854_v53 }
 0x1dd   : > { %3313 = vst [vmem:[#allocation15_spill] sm:$0xff] %v2866_v2  ;;  %v2869_v40 = vpop.eup %2057  ;;  %v826_v62 = vrot.slane %v825_v7, 1  ;;  %1617 = vmatprep.subr.bf16.mxu0 %v1355_v13  ;;  %v2873_v24 = vmul.f32 %v3315_v56, %v3314_v59  ;;  %v1186_v16 = vrot.slane %v1185_v58, 1  ;;  %v1203_v11 = vadd.f32 %v1202_v14, %v1201_v32  ;;  %v3317_v14 = vld [vmem:[#allocation25_spill] sm:$0xff] }
 0x1de   : > { %v2875_v21 = vpop.eup %2059  ;;  %v1190_v57 = vadd.f32 %v2864_v46, %v1189_v55  ;;  %v846_v54 = vrot.slane %v845_v51, 1  ;;  %v836_v61 = vrot.slane %v835_v44, 1  ;;  %v856_v10 = vrot.slane %v855_v1, 1 }
 0x1df   : > { %v2878_v47 = vpop.eup %2061  ;;  %v1208_v23 = vadd.f32 %v2875_v21, %v2869_v40  ;;  %v827_v25 = vmax.f32 %v825_v7, %v826_v62  ;;  %v1187_v30 = vadd.f32 %v1186_v16, %v1185_v58  ;;  %v1204_v53 = vrot.slane %v1203_v11, 2 }
 0x1e0   : > { %3316 = vst [vmem:[#allocation23_spill] sm:$0xff] %v2878_v47  ;;  %v2882_v39 = vpop.eup %2063  ;;  %v1191_v13 = vadd.f32 %v2866_v2, %v1190_v57  ;;  %v847_v59 = vmax.f32 %v845_v51, %v846_v54 }
 0x1e1   : > { %v2885_v33 = vpop.eup %2065  ;;  %v1209_v32 = vadd.f32 %v2878_v47, %v1208_v23  ;;  %v918_v55 = vsub.f32 %v3317_v14, %v827_v25  ;;  %v922_v28 = vsub.f32 %v3318_v35, %v827_v25  ;;  %v926_v46 = vsub.f32 %v3319_v50, %v827_v25 }
 0x1e2   : > { %2067 = vrcp.f32 %v1187_v30  ;;  %v1205_v7 = vadd.f32 %v1204_v53, %v1203_v11  ;;  %v1192_v62 = vrot.slane %v1191_v13, 4  ;;  %v930_v9 = vsub.f32 %v2605_v17, %v827_v25 }
 0x1e3   : > { %v1210_v58 = vadd.f32 %v2882_v39, %v1209_v32  ;;  %v934_v16 = vsub.f32 %v2814_v20, %v827_v25  ;;  %v1058_v51 = vmul.f32 1.442695, %v918_v55  ;;  %v1066_v57 = vmul.f32 1.442695, %v922_v28 }
 0x1e4   : > { %v1206_v54 = vrot.slane %v1205_v7, 1  ;;  %v1193_v2 = vadd.f32 %v1192_v62, %v1191_v13  ;;  %v1074_v23 = vmul.f32 1.442695, %v926_v46  ;;  %v1082_v47 = vmul.f32 1.442695, %v930_v9 }
 0x1e5   : > { %v1211_v14 = vadd.f32 %v2885_v33, %v1210_v58  ;;  %2069 = vpow2.f32 %v1058_v51  ;;  %v1090_v35 = vmul.f32 1.442695, %v934_v16  ;;  %v920_v50 = vsub.f32 %v2532_v37, %v847_v59  ;;  %v3322_v51 = vld [vmem:[#allocation40_spill] sm:$0xff] }
 0x1e6   : > { %v1207_v11 = vadd.f32 %v1206_v54, %v1205_v7  ;;  %v1194_v30 = vrot.slane %v1193_v2, 2  ;;  %2071 = vpow2.f32 %v1066_v57  ;;  %v924_v17 = vsub.f32 %v2573_v41, %v847_v59 }
 0x1e7   : > { %v1212_v53 = vrot.slane %v1211_v14, 4  ;;  %2073 = vpow2.f32 %v1074_v23  ;;  %v928_v20 = vsub.f32 %v2589_v34, %v847_v59  ;;  %v932_v28 = vsub.f32 %v2609_v0, %v847_v59 }
 0x1e8   : > { %2075 = vrcp.f32 %v1207_v11  ;;  %v1195_v46 = vadd.f32 %v1194_v30, %v1193_v2  ;;  %v936_v9 = vsub.f32 %v2822_v45, %v847_v59  ;;  %v1062_v25 = vmul.f32 1.442695, %v920_v50  ;;  %v3320_v2 = vld [vmem:[#allocation31_spill] sm:$0xff]  ;;  %v3321_v59 = vld [vmem:[#allocation10_spill] sm:$0xff] }
 0x1e9   : > { %v1213_v13 = vadd.f32 %v1212_v53, %v1211_v14  ;;  %2077 = vpow2.f32 %v1082_v47  ;;  %v1070_v32 = vmul.f32 1.442695, %v924_v17  ;;  %v1078_v37 = vmul.f32 1.442695, %v928_v20 }
 0x1ea   : > { %v1196_v55 = vrot.slane %v1195_v46, 1  ;;  %2079 = vpow2.f32 %v1090_v35  ;;  %v1086_v7 = vmul.f32 1.442695, %v932_v28  ;;  %v1094_v62 = vmul.f32 1.442695, %v936_v9 }
 0x1eb   : > { %v1214_v41 = vrot.slane %v1213_v13, 2  ;;  %2081 = vpow2.f32 %v1062_v25  ;;  %v837_v58 = vmax.f32 %v835_v44, %v836_v61  ;;  %v857_v16 = vmax.f32 %v855_v1, %v856_v10 }
 0x1ec   : > { %v2900_v34 = vpop.eup %2067  ;;  %v1197_v0 = vadd.f32 %v1196_v55, %v1195_v46  ;;  %2083 = vpow2.f32 %v1070_v32  ;;  %v1281_v45 = vmul.f32 %v3315_v56, %v3320_v2  ;;  %v2906_v47 = vmul.f32 %v3322_v51, %v3321_v59  ;;  %v3327_v59 = vld [vmem:[#allocation19_spill] sm:$0xff] }
 0x1ed   : > { %v1215_v57 = vadd.f32 %v1214_v41, %v1213_v13  ;;  %2085 = vpow2.f32 %v1078_v37  ;;  %v919_v54 = vsub.f32 %v2538_v36, %v837_v58  ;;  %v923_v23 = vsub.f32 %v2578_v4, %v837_v58 }
 0x1ee   : > { %2087 = vrcp.f32 %v1197_v0  ;;  %v927_v44 = vsub.f32 %v2591_v22, %v837_v58  ;;  %v931_v1 = vsub.f32 %v2611_v8, %v837_v58  ;;  %v935_v61 = vsub.f32 %v2829_v18, %v837_v58  ;;  %v3324_v58 = vld [vmem:[#allocation11_spill] sm:$0xff]  ;;  %v3326_v0 = vld [vmem:[#allocation44_spill] sm:$0xff] }
 0x1ef   : > { %v2913_v10 = vpop.eup %2069  ;;  %v1216_v14 = vrot.slane %v1215_v57, 1  ;;  %2089 = vpow2.f32 %v1086_v7  ;;  %v1060_v35 = vmul.f32 1.442695, %v919_v54  ;;  %v1068_v50 = vmul.f32 1.442695, %v923_v23 }
 0x1f0   : > { %v2915_v11 = vpop.eup %2071  ;;  %2091 = vpow2.f32 %v1094_v62  ;;  %v1076_v30 = vmul.f32 1.442695, %v927_v44  ;;  %v1084_v36 = vmul.f32 1.442695, %v931_v1  ;;  %v1092_v17 = vmul.f32 1.442695, %v935_v61 }
 0x1f1   : > { %v2917_v4 = vpop.eup %2073  ;;  %v1217_v53 = vadd.f32 %v1216_v14, %v1215_v57  ;;  %v1218_v8 = vadd.f32 %v2915_v11, %v2913_v10  ;;  %2093 = vpow2.f32 %v1060_v35  ;;  %v921_v22 = vsub.f32 %v3289_v31, %v857_v16  ;;  %v3329_v35 = vld [vmem:[#allocation28_spill] sm:$0xff] }
 0x1f2   : > { %v2922_v18 = vpop.eup %2075  ;;  %2095 = vpow2.f32 %v1068_v50  ;;  %v925_v20 = vsub.f32 %v2583_v48, %v857_v16  ;;  %v929_v28 = vsub.f32 %v2596_v43, %v857_v16  ;;  %v933_v46 = vsub.f32 %v2617_v3, %v857_v16 }
 0x1f3   : > { %v2927_v9 = vpop.eup %2077  ;;  %2097 = vrcp.f32 %v1217_v53  ;;  %v1219_v25 = vadd.f32 %v2917_v4, %v1218_v8  ;;  %v937_v13 = vsub.f32 %v2833_v19, %v857_v16  ;;  %v1064_v32 = vmul.f32 1.442695, %v921_v22  ;;  %v3325_v16 = vld [vmem:[#allocation18_spill] sm:$0xff]  ;;  %v3331_v53 = vld [vmem:[#allocation32_spill] sm:$0xff] }
 0x1f4   : > { %v2931_v37 = vpop.eup %2079  ;;  %2099 = vpow2.f32 %v1076_v30  ;;  %v1072_v31 = vmul.f32 1.442695, %v925_v20  ;;  %v1080_v55 = vmul.f32 1.442695, %v929_v28  ;;  %v1088_v7 = vmul.f32 1.442695, %v933_v46 }
 0x1f5   : > { %3323 = vst [vmem:[#allocation24_spill] sm:$0xff] %v2931_v37  ;;  %v2933_v62 = vpop.eup %2081  ;;  %v1220_v48 = vadd.f32 %v2927_v9, %v1219_v25  ;;  %2101 = vpow2.f32 %v1084_v36  ;;  %v1096_v43 = vmul.f32 1.442695, %v937_v13  ;;  %v1357_v3 = vpack.c.bf16 %v1281_v45, %v2873_v24  ;;  %v3328_v24 = vld [vmem:[#allocation26_spill] sm:$0xff] }
 0x1f6   : > { %v2937_v41 = vpop.eup %2083  ;;  %2103 = vpow2.f32 %v1092_v17  ;;  %v1278_v19 = vmul.f32 %v3322_v51, %v3324_v58  ;;  %v1276_v2 = vmul.f32 %v3326_v0, %v3325_v16  ;;  %v1280_v57 = vmul.f32 %v3326_v0, %v3327_v59  ;;  %v3334_v46 = vld [vmem:[#allocation14_spill] sm:$0xff]  ;;  %v3336_v58 = vld [vmem:[#allocation20_spill] sm:$0xff]  ;;  %v3337_v16 = vld [vmem:[#allocation21_spill] sm:$0xff] }
 0x1f7   : > { %v2945_v54 = vpop.eup %2085  ;;  %v1221_v23 = vadd.f32 %v2931_v37, %v1220_v48  ;;  %v1238_v44 = vadd.f32 %v2937_v41, %v2933_v62  ;;  %2105 = vpow2.f32 %v1064_v32  ;;  %1658 = vmatprep.subr.bf16.mxu1 %v1357_v3  ;;  %v1283_v45 = vmul.f32 %v2702_v6, %v3328_v24  ;;  %v3338_v59 = vld [vmem:[#allocation29_spill] sm:$0xff] }
 0x1f8   : > { %v2952_v1 = vpop.eup %2087  ;;  %2107 = vpow2.f32 %v1072_v31  ;;  %v1354_v61 = vpack.c.bf16 %v1278_v19, %v2906_v47  ;;  %v1356_v14 = vpack.c.bf16 %v1280_v57, %v1276_v2  ;;  %v1287_v50 = vmul.f32 %v2702_v6, %v3329_v35  ;;  %v3333_v47 = vld [vmem:[#allocation34_spill] sm:$0xff]  ;;  %v3339_v35 = vld [vmem:[#allocation49_spill] sm:$0xff] }
 0x1f9   : > { %v2957_v30 = vpop.eup %2089  ;;  %v1222_v36 = vrot.slane %v1221_v23, 4  ;;  %v1239_v17 = vadd.f32 %v2945_v54, %v1238_v44  ;;  %2109 = vpow2.f32 %v1080_v55  ;;  %v1285_v8 = vmul.f32 %v3315_v56, %v3331_v53  ;;  %v3335_v55 = vld [vmem:[#allocation16_spill] sm:$0xff] }
 0x1fa   : > { %3330 = vst [vmem:[#allocation30_spill] sm:$0xff] %v2957_v30  ;;  %v2962_v22 = vpop.eup %2091  ;;  %2111 = vpow2.f32 %v1088_v7  ;;  %1618 = vmatpush1.bf16.msra.mxu0 %v1354_v61  ;;  %1659 = vmatpush1.bf16.msra.mxu1 %v1356_v14  ;;  %v1359_v20 = vpack.c.bf16 %v1287_v50, %v1283_v45  ;;  %v1289_v28 = vmul.f32 %v3315_v56, %v3333_v47 }
 0x1fb   : > { %3332 = vst [vmem:[#allocation53_spill] sm:$0xff] %v2962_v22  ;;  %v1282_v25 = vmul.f32 %v3322_v51, %v3334_v46  ;;  %v2968_v13 = vpop.eup %2093  ;;  %v1223_v32 = vadd.f32 %v1222_v36, %v1221_v23  ;;  %v1240_v31 = vadd.f32 %v2957_v30, %v1239_v17  ;;  %2113 = vpow2.f32 %v1096_v43  ;;  %v3340_v36 = vld [vmem:[#allocation35_spill] sm:$0xff]  ;;  %v3342_v46 = vld [vmem:[#allocation17_spill] sm:$0xff] }
 0x1fc   : > { %v1286_v48 = vmul.f32 %v3322_v51, %v3335_v55  ;;  %v2973_v3 = vpop.eup %2095  ;;  %1619 = vmatprep.subr.bf16.mxu0 %v1359_v20  ;;  %v1361_v7 = vpack.c.bf16 %v1289_v28, %v1285_v8  ;;  %v1284_v19 = vmul.f32 %v3326_v0, %v3336_v58  ;;  %v1288_v2 = vmul.f32 %v3326_v0, %v3337_v16  ;;  %v3345_v58 = vld [vmem:[#allocation22_spill] sm:$0xff]  ;;  %v3357_v30 = vld [vmem:[#allocation41_spill] sm:$0xff] }
 0x1fd   : > { %v1291_v57 = vmul.f32 %v2702_v6, %v3338_v59  ;;  %v2981_v23 = vpop.eup %2097  ;;  %v1224_v44 = vrot.slane %v1223_v32, 2  ;;  %v1241_v43 = vadd.f32 %v2962_v22, %v1240_v31  ;;  %v1228_v24 = vadd.f32 %v2973_v3, %v2968_v13  ;;  %v3341_v6 = vld [vmem:[#allocation55_spill] sm:$0xff] }
 0x1fe   : > { %v1358_v45 = vpack.c.bf16 %v1286_v48, %v1282_v25  ;;  %v2986_v61 = vpop.eup %2099  ;;  %1660 = vmatprep.subr.bf16.mxu1 %v1361_v7  ;;  %v1360_v14 = vpack.c.bf16 %v1288_v2, %v1284_v19  ;;  %v1295_v50 = vmul.f32 %v2816_v27, %v3339_v35  ;;  %v1293_v17 = vmul.f32 %v3315_v56, %v3340_v36  ;;  %v3344_v7 = vld [vmem:[#allocation37_spill] sm:$0xff]  ;;  %v3348_v35 = vld [vmem:[#allocation51_spill] sm:$0xff] }
 0x1ff   : > { %v1297_v53 = vmul.f32 %v2850_v29, %v3341_v6  ;;  %v2994_v8 = vpop.eup %2101  ;;  %v1225_v20 = vadd.f32 %v1224_v44, %v1223_v32  ;;  %v1242_v47 = vrot.slane %v1241_v43, 4  ;;  %v1229_v28 = vadd.f32 %v2986_v61, %v1228_v24  ;;  %v3346_v44 = vld [vmem:[#allocation43_spill] sm:$0xff] }
 0x200   : > { %1620 = vmatpush1.bf16.msra.mxu0 %v1358_v45  ;;  %v1290_v25 = vmul.f32 %v3322_v51, %v3342_v46  ;;  %v2999_v31 = vpop.eup %2103  ;;  %1661 = vmatpush1.bf16.msra.mxu1 %v1360_v14  ;;  %v1880_v55 = vpack.c.bf16 %v1295_v50, %v1291_v57  ;;  %v1294_v56 = vmul.f32 %v2761_v12, %v3344_v7  ;;  %v3347_v45 = vld [vmem:[#allocation50_spill] sm:$0xff]  ;;  %v3352_v7 = vld [vmem:[#allocation52_spill] sm:$0xff] }
 0x201   : > { %3343 = vst [vmem:[#allocation25_spill] sm:$0xff] %v2999_v31  ;;  %v1882_v48 = vpack.c.bf16 %v1297_v53, %v1293_v17  ;;  %v1292_v19 = vmul.f32 %v3326_v0, %v3345_v58  ;;  %v3005_v16 = vpop.eup %2105  ;;  %v1226_v32 = vrot.slane %v1225_v20, 1  ;;  %v1243_v2 = vadd.f32 %v1242_v47, %v1241_v43 }
 0x202   : > { %v1230_v59 = vadd.f32 %v2994_v8, %v1229_v28  ;;  %v3010_v51 = vmul.f32 %v2782_v42, %v3346_v44  ;;  %v3012_v24 = vpop.eup %2107  ;;  %1621 = vmatprep.subr.bf16.mxu0 %v1880_v55  ;;  %v1879_v57 = vpack.c.bf16 %v1294_v56, %v1290_v25  ;;  %v1299_v14 = vmul.f32 %v2816_v27, %v3347_v45  ;;  %v3349_v28 = vld [vmem:[#allocation3_spill] sm:$0xff] }
 0x203   : > { %1662 = vmatprep.subr.bf16.mxu1 %v1882_v48  ;;  %v1303_v0 = vmul.f32 %v2816_v27, %v3348_v35  ;;  %v3018_v36 = vpop.eup %2109  ;;  %v1227_v43 = vadd.f32 %v1226_v32, %v1225_v20  ;;  %v1244_v17 = vrot.slane %v1243_v2, 2  ;;  %v1248_v47 = vadd.f32 %v3012_v24, %v3005_v16  ;;  %v3353_v32 = vld [vmem:[#allocation56_spill] sm:$0xff] }
 0x204   : > { %v1231_v6 = vadd.f32 %v2999_v31, %v1230_v59  ;;  %v3350_v46 = vrot.slane %v3349_v28, 2  ;;  %v3027_v55 = vpop.eup %2111  ;;  %1622 = vmatpush1.bf16.msra.mxu0 %v1879_v57  ;;  %v1881_v48 = vpack.c.bf16 %v3010_v51, %v1292_v19  ;;  %v1307_v20 = vmul.f32 %v2816_v27, %v3352_v7  ;;  %v3354_v57 = vld [vmem:[#allocation27_spill] sm:$0xff] }
 0x205   : > { %v1367_v58 = vpack.c.bf16 %v1299_v14, %v1295_v50  ;;  %v1301_v59 = vmul.f32 %v2850_v29, %v3353_v32  ;;  %v3034_v44 = vpop.eup %2113  ;;  %2115 = vrcp.f32 %v1227_v43  ;;  %v1245_v45 = vadd.f32 %v1244_v17, %v1243_v2  ;;  %v3355_v2 = vld [vmem:[#allocation38_spill] sm:$0xff] }
 0x206   : > { %1875 = vmatprep.mubr.msk.bf16.mxu0 %vm1613_vm3, %v3350_v46  ;;  %v3351_v25 = vmov %v3350_v46  ;;  %v1232_v35 = vrot.slane %v1231_v6, 4  ;;  %v1249_v28 = vadd.f32 %v3018_v36, %v1248_v47  ;;  %1663 = vmatpush1.bf16.msra.mxu1 %v1881_v48  ;;  %v1371_v46 = vpack.c.bf16 %v1307_v20, %v1303_v0  ;;  %v3356_v47 = vld [vmem:[#allocation39_spill] sm:$0xff] }
 0x207   : > { %1876 = vmatprep.mubr.msk.bf16.mxu1 %vm1613_vm3, %v3351_v25  ;;  %v1475_v25 = vunpack.c.h.b16 %v1367_v58  ;;  %v1305_v19 = vmul.f32 %v2850_v29, %v3354_v57  ;;  %v1309_v7 = vmul.f32 %v2850_v29, %v2741_v60  ;;  %v1246_v50 = vrot.slane %v1245_v45, 1 }
 0x208   : > { %v1233_v14 = vadd.f32 %v1232_v35, %v1231_v6  ;;  %v1250_v32 = vadd.f32 %v3027_v55, %v1249_v28  ;;  %v1369_v22 = vpack.c.bf16 %v1301_v59, %v1297_v53  ;;  %v1479_v37 = vunpack.c.l.b16 %v1371_v46  ;;  %v3358_v28 = vld [vmem:[#allocation45_spill] sm:$0xff] }
 0x209   : > { %v1373_v43 = vpack.c.bf16 %v1309_v7, %v1305_v19  ;;  %v1298_v17 = vmul.f32 %v2761_v12, %v3355_v2  ;;  %v1302_v0 = vmul.f32 %v2761_v12, %v3356_v47  ;;  %v1247_v48 = vadd.f32 %v1246_v50, %v1245_v45  ;;  %v3359_v50 = vld [vmem:[#allocation46_spill] sm:$0xff] }
 0x20a   : > { %v1234_v20 = vrot.slane %v1233_v14, 2  ;;  %v1251_v58 = vadd.f32 %v3034_v44, %v1250_v32  ;;  %v1477_v57 = vunpack.c.h.b16 %v1369_v22  ;;  %v1546_v31 = vpack.c.b16 %v1479_v37, %v1475_v25  ;;  %v3360_v25 = vld [vmem:[#allocation47_spill] sm:$0xff] }
 0x20b   : > { %v1481_v60 = vunpack.c.l.b16 %v1373_v43  ;;  %v1306_v6 = vmul.f32 %v2761_v12, %v3357_v30  ;;  %v1366_v35 = vpack.c.bf16 %v1298_v17, %v1294_v56  ;;  %2117 = vrcp.f32 %v1247_v48 }
 0x20c   : > { %v1235_v53 = vadd.f32 %v1234_v20, %v1233_v14  ;;  %v1252_v59 = vrot.slane %v1251_v58, 4  ;;  %v1300_v19 = vmul.f32 %v2782_v42, %v3358_v28  ;;  %1623 = vmatprep.subr.bf16.mxu0 %v1546_v31  ;;  %v1304_v32 = vmul.f32 %v2782_v42, %v3359_v50  ;;  %v3361_v14 = vld [vmem:[#allocation54_spill] sm:$0xff] }
 0x20d   : > { %v1548_v7 = vpack.c.b16 %v1481_v60, %v1477_v57  ;;  %v1370_v2 = vpack.c.bf16 %v1306_v6, %v1302_v0  ;;  %v1474_v45 = vunpack.c.h.b16 %v1366_v35  ;;  %v1308_v47 = vmul.f32 %v2782_v42, %v3360_v25 }
 0x20e   : > { %v1236_v22 = vrot.slane %v1235_v53, 1  ;;  %v1253_v37 = vadd.f32 %v1252_v59, %v1251_v58  ;;  %v1368_v30 = vpack.c.bf16 %v1300_v19, %v3010_v51  ;;  %v1311_v17 = vmul.f32 %v2816_v27, %v3361_v14 }
 0x20f   : > { %1664 = vmatprep.subr.bf16.mxu1 %v1548_v7  ;;  %v1478_v56 = vunpack.c.l.b16 %v1370_v2  ;;  %v1483_v48 = vunpack.c.h.b16 %v1371_v46  ;;  %v1313_v31 = vmul.f32 %v2850_v29, %v2743_v15  ;;  %v3060_v0 = vpop.eup %2115  ;;  %v1372_v60 = vpack.c.bf16 %v1308_v47, %v1304_v32  ;;  %v3362_v7 = vld [vmem:[#allocation42_spill] sm:$0xff]  ;;  %v3363_v29 = vld [vmem:[#allocation48_spill] sm:$0xff] }
 0x210   : > { %v1237_v20 = vadd.f32 %v1236_v22, %v1235_v53  ;;  %v1254_v57 = vrot.slane %v1253_v37, 2  ;;  %v1476_v58 = vunpack.c.h.b16 %v1368_v30  ;;  %v1375_v35 = vpack.c.bf16 %v1311_v17, %v1311_v17 }
 0x211   : > { %v1545_v6 = vpack.c.b16 %v1478_v56, %v1474_v45  ;;  %v1377_v59 = vpack.c.bf16 %v1313_v31, %v1313_v31  ;;  %v1485_v28 = vunpack.c.h.b16 %v1373_v43  ;;  %v1480_v19 = vunpack.c.l.b16 %v1372_v60 }
 0x212   : > { %2119 = vrcp.f32 %v1237_v20  ;;  %v1255_v51 = vadd.f32 %v1254_v57, %v1253_v37  ;;  %v1310_v27 = vmul.f32 %v2761_v12, %v3362_v7  ;;  %v1487_v46 = vunpack.c.l.b16 %v1375_v35 }
 0x213   : > { %1624 = vmatpush1.bf16.msra.mxu0 %v1545_v6  ;;  %v1489_v50 = vunpack.c.l.b16 %v1377_v59  ;;  %v1482_v15 = vunpack.c.h.b16 %v1370_v2  ;;  %v1312_v53 = vmul.f32 %v2782_v42, %v3363_v29  ;;  %v1547_v32 = vpack.c.b16 %v1480_v19, %v1476_v58  ;;  %v3367_v19 = vld [vmem:[#allocation4_spill] sm:$0xff]  ;;  %v3369_v29 = vld [vmem:[#allocation5_spill] sm:$0xff] }
 0x214   : > { %v1256_v22 = vrot.slane %v1255_v51, 1  ;;  %v1374_v25 = vpack.c.bf16 %v1310_v27, %v1310_v27  ;;  %v1484_v45 = vunpack.c.h.b16 %v1372_v60  ;;  %v1550_v47 = vpack.c.b16 %v1487_v46, %v1483_v48 }
 0x215   : > { %v1552_v30 = vpack.c.b16 %v1489_v50, %v1485_v28  ;;  %v1376_v43 = vpack.c.bf16 %v1312_v53, %v1312_v53  ;;  %v1315_v37 = vmul.f32 %v2952_v1, %v2848_v5  ;;  %v3068_v56 = vpop.eup %2117  ;;  %1665 = vmatpush1.bf16.msra.mxu1 %v1547_v32  ;;  %v1319_v2 = vmul.f32 %v2952_v1, %v2855_v49 }
 0x216   : > { %v1257_v12 = vadd.f32 %v1256_v22, %v1255_v51  ;;  %v1486_v14 = vunpack.c.l.b16 %v1374_v25  ;;  %v1317_v42 = vmul.f32 %v2981_v23, %v2869_v40  ;;  %1625 = vmatprep.subr.bf16.mxu0 %v1550_v47  ;;  %v1321_v48 = vmul.f32 %v2981_v23, %v2875_v21  ;;  %v3364_v21 = vld [vmem:[#allocation6_spill] sm:$0xff]  ;;  %v3370_v22 = vld [vmem:[#allocation8_spill] sm:$0xff]  ;;  %v3371_v25 = vld [vmem:[#allocation15_spill] sm:$0xff] }
 0x217   : > { %1666 = vmatprep.subr.bf16.mxu1 %v1552_v30  ;;  %v1488_v17 = vunpack.c.l.b16 %v1376_v43  ;;  %v1314_v5 = vmul.f32 %v2900_v34, %v2780_v63  ;;  %v1318_v31 = vmul.f32 %v2900_v34, %v2786_v26  ;;  %v1379_v57 = vpack.c.bf16 %v1319_v2, %v1315_v37  ;;  %v3365_v63 = vld [vmem:[#allocation9_spill] sm:$0xff]  ;;  %v3366_v26 = vld [vmem:[#allocation23_spill] sm:$0xff]  ;;  %v3372_v37 = vld [vmem:[#allocation12_spill] sm:$0xff] }
 0x218   : > { %2121 = vrcp.f32 %v1257_v12  ;;  %v1549_v20 = vpack.c.b16 %v1486_v14, %v1482_v15  ;;  %v1316_v49 = vmul.f32 %v2922_v18, %v2806_v38  ;;  %v1381_v40 = vpack.c.bf16 %v1321_v48, %v1317_v42  ;;  %v3373_v2 = vld [vmem:[#allocation13_spill] sm:$0xff] }
 0x219   : > { %v1551_v60 = vpack.c.b16 %v1488_v17, %v1484_v45  ;;  %v1378_v58 = vpack.c.bf16 %v1318_v31, %v1314_v5  ;;  %v1320_v6 = vmul.f32 %v2922_v18, %v2824_v52  ;;  %v1323_v35 = vmul.f32 %v2952_v1, %v3364_v21  ;;  %v3368_v52 = vld [vmem:[#allocation7_spill] sm:$0xff] }
 0x21a   : > { %1626 = vmatpush1.bf16.msra.mxu0 %v1549_v20  ;;  %v1327_v59 = vmul.f32 %v2952_v1, %v3365_v63  ;;  %v1325_v28 = vmul.f32 %v2981_v23, %v3366_v26  ;;  %v1329_v51 = vmul.f32 %v2981_v23, %v2882_v39  ;;  %v1322_v7 = vmul.f32 %v2900_v34, %v3367_v19  ;;  %v3375_v26 = vld [vmem:[#allocation25_spill] sm:$0xff] }
 0x21b   : > { %1667 = vmatpush1.bf16.msra.mxu1 %v1551_v60  ;;  %1627 = vmatprep.subr.bf16.mxu0 %v1379_v57  ;;  %v1380_v38 = vpack.c.bf16 %v1320_v6, %v1316_v49  ;;  %v1326_v27 = vmul.f32 %v2900_v34, %v3368_v52  ;;  %v1324_v53 = vmul.f32 %v2922_v18, %v3369_v29 }
 0x21c   : > { %v2120_v46 = vpop.eup %2119  ;;  %1668 = vmatprep.subr.bf16.mxu1 %v1381_v40  ;;  %v1383_v50 = vpack.c.bf16 %v1327_v59, %v1323_v35  ;;  %v1385_v15 = vpack.c.bf16 %v1329_v51, %v1325_v28  ;;  %v1328_v32 = vmul.f32 %v2922_v18, %v3370_v22  ;;  %v1331_v45 = vmul.f32 %v2952_v1, %v3371_v25 }
 0x21d   : > { %v1382_v39 = vpack.c.bf16 %v1326_v27, %v1322_v7  ;;  %v1335_v47 = vmul.f32 %v2120_v46, %v2968_v13  ;;  %v1333_v30 = vmul.f32 %v2981_v23, %v2885_v33  ;;  %v1330_v12 = vmul.f32 %v2900_v34, %v3372_v37 }
 0x21e   : > { %1628 = vmatpush1.bf16.msra.mxu0 %v1378_v58  ;;  %v1384_v43 = vpack.c.bf16 %v1328_v32, %v1324_v53  ;;  %v1334_v14 = vmul.f32 %v3060_v0, %v2913_v10  ;;  %v1332_v42 = vmul.f32 %v2922_v18, %v3373_v2  ;;  %v1336_v1 = vmul.f32 %v3068_v56, %v2933_v62  ;;  %v3377_v32 = vld [vmem:[#allocation53_spill] sm:$0xff] }
 0x21f   : > { %1669 = vmatpush1.bf16.msra.mxu1 %v1380_v38  ;;  %1629 = vmatprep.subr.bf16.mxu0 %v1383_v50  ;;  %v1884_v17 = vpack.c.bf16 %v1335_v47, %v1331_v45  ;;  %v1339_v13 = vmul.f32 %v2120_v46, %v2973_v3  ;;  %v1343_v23 = vmul.f32 %v2120_v46, %v2986_v61 }
 0x220   : > { %1670 = vmatprep.subr.bf16.mxu1 %v1385_v15  ;;  %v1883_v33 = vpack.c.bf16 %v1334_v14, %v1330_v12  ;;  %v1347_v34 = vmul.f32 %v2120_v46, %v2994_v8  ;;  %v1338_v10 = vmul.f32 %v3060_v0, %v2915_v11  ;;  %v1885_v48 = vpack.c.bf16 %v1336_v1, %v1332_v42  ;;  %v3376_v15 = vld [vmem:[#allocation24_spill] sm:$0xff]  ;;  %v3378_v42 = vld [vmem:[#allocation2_spill] sm:$0xff] }
 0x221   : > { %v1391_v5 = vpack.c.bf16 %v1339_v13, %v1335_v47  ;;  %v1342_v18 = vmul.f32 %v3060_v0, %v2917_v4  ;;  %v1346_v31 = vmul.f32 %v3060_v0, %v2927_v9  ;;  %v1340_v61 = vmul.f32 %v3068_v56, %v2937_v41  ;;  %v3374_v41 = vld [vmem:[#allocation30_spill] sm:$0xff] }
 0x222   : > { %v2122_v62 = vpop.eup %2121  ;;  %1630 = vmatpush1.bf16.msra.mxu0 %v1382_v39  ;;  %v1395_v3 = vpack.c.bf16 %v1347_v34, %v1343_v23  ;;  %v1390_v20 = vpack.c.bf16 %v1338_v10, %v1334_v14  ;;  %v1344_v8 = vmul.f32 %v3068_v56, %v2945_v54  ;;  %v1348_v35 = vmul.f32 %v3068_v56, %v3374_v41 }
 0x223   : > { %1671 = vmatpush1.bf16.msra.mxu1 %v1384_v43  ;;  %1631 = vmatprep.subr.bf16.mxu0 %v1884_v17  ;;  %v1337_v11 = vmul.f32 %v2122_v62, %v3005_v16  ;;  %v1515_v57 = vunpack.c.h.b16 %v1391_v5  ;;  %v1341_v4 = vmul.f32 %v2122_v62, %v3012_v24  ;;  %v1345_v49 = vmul.f32 %v2122_v62, %v3018_v36 }
 0x224   : > { %v1519_v9 = vunpack.c.l.b16 %v1395_v3  ;;  %v1349_v60 = vmul.f32 %v2122_v62, %v3027_v55  ;;  %v1394_v40 = vpack.c.bf16 %v1346_v31, %v1342_v18  ;;  %v1514_v58 = vunpack.c.h.b16 %v1390_v20 }
 0x225   : > { %v1886_v6 = vpack.c.bf16 %v1337_v11, %v1333_v30  ;;  %v1393_v21 = vpack.c.bf16 %v1341_v4, %v1337_v11  ;;  %v1392_v54 = vpack.c.bf16 %v1340_v61, %v1336_v1  ;;  %v1351_v28 = vmul.f32 %v2120_v46, %v3375_v26 }
 0x226   : > { %1632 = vmatpush1.bf16.msra.mxu0 %v1883_v33  ;;  %v1566_v63 = vpack.c.b16 %v1519_v9, %v1515_v57  ;;  %v1397_v59 = vpack.c.bf16 %v1349_v60, %v1345_v49  ;;  %v1518_v16 = vunpack.c.l.b16 %v1394_v40  ;;  %v1396_v36 = vpack.c.bf16 %v1348_v35, %v1344_v8 }
 0x227   : > { %1672 = vmatprep.subr.bf16.mxu1 %v1886_v6  ;;  %v1517_v24 = vunpack.c.h.b16 %v1393_v21  ;;  %v1516_v51 = vunpack.c.h.b16 %v1392_v54  ;;  %v1523_v38 = vunpack.c.h.b16 %v1395_v3  ;;  %v1399_v7 = vpack.c.bf16 %v1351_v28, %v1351_v28 }
 0x228   : > { %1673 = vmatpush1.bf16.msra.mxu1 %v1885_v48  ;;  %1633 = vmatprep.subr.bf16.mxu0 %v1566_v63  ;;  %v1521_v55 = vunpack.c.l.b16 %v1397_v59  ;;  %v1565_v19 = vpack.c.b16 %v1518_v16, %v1514_v58  ;;  %v1353_v52 = vmul.f32 %v2122_v62, %v3034_v44  ;;  %v1520_v27 = vunpack.c.l.b16 %v1396_v36 }
 0x229   : > { %v1525_v50 = vunpack.c.h.b16 %v1397_v59  ;;  %v1350_v29 = vmul.f32 %v3060_v0, %v3376_v15  ;;  %v1527_v46 = vunpack.c.l.b16 %v1399_v7  ;;  %v1352_v39 = vmul.f32 %v3068_v56, %v3377_v32 }
 0x22a   : > { %v1568_v53 = vpack.c.b16 %v1521_v55, %v1517_v24  ;;  %1634 = vmatpush1.bf16.msra.mxu0 %v1565_v19  ;;  %v1401_v22 = vpack.c.bf16 %v1353_v52, %v1353_v52  ;;  %v1567_v25 = vpack.c.b16 %v1520_v27, %v1516_v51  ;;  %v1522_v47 = vunpack.c.h.b16 %v1394_v40 }
 0x22b   : > { %v1398_v45 = vpack.c.bf16 %v1350_v29, %v1350_v29  ;;  %v1570_v30 = vpack.c.b16 %v1527_v46, %v1523_v38  ;;  %v1400_v44 = vpack.c.bf16 %v1352_v39, %v1352_v39  ;;  %v1524_v37 = vunpack.c.h.b16 %v1396_v36 }
 0x22c   : > { %1674 = vmatprep.subr.bf16.mxu1 %v1568_v53  ;;  %v1529_v43 = vunpack.c.l.b16 %v1401_v22  ;;  %v1530_v17 = vrot.slane %v3378_v42, 2 }
 0x22d   : > { %1675 = vmatpush1.bf16.msra.mxu1 %v1567_v25  ;;  %v1526_v12 = vunpack.c.l.b16 %v1398_v45  ;;  %1635 = vmatprep.subr.bf16.mxu0 %v1570_v30  ;;  %v1528_v14 = vunpack.c.l.b16 %v1400_v44 }
 0x22e   : > { %v1572_v0 = vpack.c.b16 %v1529_v43, %v1525_v50 }
 0x22f   : > { %v1569_v2 = vpack.c.b16 %v1526_v12, %v1522_v47  ;;  %v1571_v56 = vpack.c.b16 %v1528_v14, %v1524_v37 }
 0x230   : > { %1676 = vmatprep.subr.bf16.mxu1 %v1572_v0 }
 0x231   : > { %1636 = vmatpush1.bf16.msra.mxu0 %v1569_v2  ;;  %1677 = vmatpush1.bf16.msra.mxu1 %v1571_v56 }
 0x234   : > { %1650 = vmatmul.mubr.bf16.vlgmr.msra.gmra.mrb[40].mxu0 %v1530_v17  ;;  %1691 = vmatmul.mubr.bf16.vlgmr.msra.gmra.mrb[40].mxu1 %v1530_v17 }
 0x307   : > { %v1651_v1 = vpop.f32.mrb[40].mxu0  ;;  %v1692_v33 = vpop.f32.mrb[40].mxu1 }
 0x308   : > { %v1653_v13 = vpop.f32.mrb[41].mxu0  ;;  %v1694_v10 = vpop.f32.mrb[41].mxu1 }
 0x309   : > { %v1699_v23 = vadd.f32 %v1653_v13, %v1651_v1  ;;  %v1655_v34 = vpop.f32.mrb[42].mxu0  ;;  %v1696_v5 = vpop.f32.mrb[42].mxu1 }
 0x30a   : > { %v1656_v48 = vpop.f32.mrb[43].mxu0  ;;  %v1697_v31 = vpop.f32.mrb[43].mxu1 }
 0x30b   : > { %v1700_v18 = vadd.f32 %v1699_v23, %v1692_v33 }
 0x30d   : > { %v1701_v62 = vadd.f32 %v1700_v18, %v1694_v10 }
 0x30f   : > { %1702 = vst [vmem:[%s237_s7] sm:$0xf] %v1701_v62 }
 0x310 PF: > { %s12_s13 = sadd.s32 1, %s2161_s13   ;;  %s3379_s9 = smov %s2153_s11 }
 0x311   : > { %p9_p7 = scmp.ge.s32.totalorder %s12_s13, 6   ;;  %s3380_s10 = smov %s2157_s12 }
 0x312   : > { %s3381_s11 = smov %s3384_s14  ;;  %s3382_s12 = smov %s3388_s15 }
 0x313   :  { %11 = sbr.rel (!%p9_p7) target bundleno = 3 (0x3), region = 62 }

</bundles_post_ra>
